<compile_context>
chip_gen: v7x
topology: tpu7x:2x2x1
jax: 0.10.0
libtpu: 0.0.40
codegen_flags: <defaults>
</compile_context>

<pallas_src>
import functools

import jax
import jax.numpy as jnp
from jax.experimental import pallas as pl
from jax.experimental.pallas import tpu as pltpu

BN_EPS = 1e-5
LEAKY_SLOPE = 0.01  # torch.nn.functional.leaky_relu default

# Logical (PyTorch) layer sizes.
DIMS = [(200, 400), (400, 200), (200, 100), (100, 2)]
IN_F = 200
OUT_F = 2

# Kernel-side weight shapes: input width of fc1 stays at the raw 200 (x is fed
# unpadded); every output width is padded to a multiple of 128 so matmuls /
# BN broadcasts are full-vreg.  Padded rows/cols of the weights are zero.
PAD_IN = [200, 512, 256, 128]
PAD_OUT = [512, 256, 128, 128]


def _device_kind() -> str:
    try:
        return jax.devices()[0].device_kind.lower()
    except Exception:
        return ""


_KIND = _device_kind()
# v5e and older have no bf16 VALU: only enable the bf16 BN-apply path on v6e+.
_OLD_GEN = any(t in _KIND for t in ("v2", "v3", "v4", "v5"))
BF16_APPLY_DEFAULT = not _OLD_GEN
# v5e/v6e have 128 MiB physical VMEM → big tiles + 64 MiB scoped limit.
# v7x (64 MiB physical) / unknown → conservative tile cap and 32 MiB limit.
_BIG_VMEM = any(t in _KIND for t in ("v5", "v6"))
TM_MAX = 2048 if _BIG_VMEM else 1024
VMEM_LIMIT_BYTES = (64 if _BIG_VMEM else 32) * 1024 * 1024

# NOTE: the resident parameter BlockSpecs could additionally use
# pipeline_mode=pl.Buffered(1) to drop their second buffer (~0.6 MB VMEM);
# left at the default for maximum compiler compatibility since the footprint
# here is far below the limit anyway.


def siamese_kernel(
    x_ref,
    w1_ref, g1_ref, be1_ref,
    w2_ref, g2_ref, be2_ref,
    w3_ref, g3_ref, be3_ref,
    w4_ref, g4_ref, be4_ref,
    o_ref,
    *, n_rows, tile_rows, needs_mask, bf16_apply,
):
    act_dtype = jnp.bfloat16 if bf16_apply else jnp.float32

    if needs_mask:
        i = pl.program_id(0)
        n_valid = jnp.clip(n_rows - i * tile_rows, 1, tile_rows)
        inv_n = 1.0 / jnp.full((1, 1), n_valid, dtype=jnp.float32)
        row_ids = jax.lax.broadcasted_iota(jnp.int32, (tile_rows, 1), 0)
        mask = row_ids < n_valid
    else:
        inv_n = jnp.float32(1.0 / tile_rows)
        mask = None

    def bn_scale_shift(h, gamma, beta):
        # Single-pass batch statistics (training-mode BN), folded affine.
        s1 = jnp.sum(h, axis=0, keepdims=True)
        s2 = jnp.sum(h * h, axis=0, keepdims=True)
        mean = s1 * inv_n
        var = s2 * inv_n - mean * mean
        scale = gamma * jax.lax.rsqrt(var + BN_EPS)
        shift = beta - mean * scale
        return scale, shift

    def bn_leaky(h, gamma, beta):
        scale, shift = bn_scale_shift(h, gamma, beta)
        z = h.astype(act_dtype) * scale.astype(act_dtype) + shift.astype(act_dtype)
        z = jnp.maximum(z, LEAKY_SLOPE * z)          # leaky_relu (slope < 1)
        if mask is not None:
            z = jnp.where(mask, z, 0)                # keep padded rows exactly 0
        return z.astype(jnp.bfloat16)                # MXU feed for next layer

    # fc1 -> bn1 -> leaky_relu   (bias omitted: cancels under batch-stat BN)
    h = jnp.dot(x_ref[...].astype(jnp.bfloat16), w1_ref[...],
                preferred_element_type=jnp.float32)
    if mask is not None:
        h = jnp.where(mask, h, 0.0)                  # boundary-tile garbage rows
    h = bn_leaky(h, g1_ref[...], be1_ref[...])

    # fc2 -> bn2 -> leaky_relu
    h = jnp.dot(h, w2_ref[...], preferred_element_type=jnp.float32)
    h = bn_leaky(h, g2_ref[...], be2_ref[...])

    # fc3 -> bn3 -> leaky_relu
    h = jnp.dot(h, w3_ref[...], preferred_element_type=jnp.float32)
    h = bn_leaky(h, g3_ref[...], be3_ref[...])

    # fc4 -> bn4 -> sigmoid  (only the 2 real lanes are applied and stored)
    h = jnp.dot(h, w4_ref[...], preferred_element_type=jnp.float32)
    scale, shift = bn_scale_shift(h, g4_ref[...], be4_ref[...])
    logit = h[:, :OUT_F] * scale[:, :OUT_F] + shift[:, :OUT_F]
    o_ref[...] = pl.reciprocal(1.0 + jnp.exp(-logit),
                               approx=True).astype(o_ref.dtype)


def prepare_params(raw):
    """Zero-pad feature dims to the kernel shapes, cast weights to bf16.

    Linear biases are intentionally not packed: under training-mode BatchNorm
    (batch statistics) they cancel exactly.  Padded gamma lanes are 1 and
    padded beta lanes 0 so padded columns stay exactly 0 through every layer.
    """
    p = {}
    for idx, ((din, dout), kin, kout) in enumerate(zip(DIMS, PAD_IN, PAD_OUT), 1):
        w = jnp.zeros((kin, kout), jnp.float32).at[:din, :dout].set(raw[f"w{idx}"])
        p[f"w{idx}"] = w.astype(jnp.bfloat16)
        p[f"g{idx}"] = jnp.ones((1, kout), jnp.float32).at[:, :dout].set(raw[f"g{idx}"])
        p[f"be{idx}"] = jnp.zeros((1, kout), jnp.float32).at[:, :dout].set(raw[f"be{idx}"])
    return p


def siamese_forward(x, padded_params, *, min_tiles=1, bf16_apply=None):
    """x: (N, 200) float32.  padded_params: output of prepare_params.

    min_tiles: set >= 2 on v7x for large batches so the parallel grid axis
    shards across both TensorCores (accepting per-tile "ghost" BN statistics).
    """
    if bf16_apply is None:
        bf16_apply = BF16_APPLY_DEFAULT
    n, f = x.shape
    assert f == IN_F
    x = x.astype(jnp.float32)

    target = -(-n // max(min_tiles, 1))                  # cdiv(n, min_tiles)
    tm = min(TM_MAX, max(8, ((target + 7) // 8) * 8))    # row tile, multiple of 8
    n_tiles = -(-n // tm)
    needs_mask = (n % tm) != 0

    args = [x]
    in_specs = [pl.BlockSpec((tm, IN_F), lambda i: (i, 0))]   # raw f32 x, streamed
    for idx, (kin, kout) in enumerate(zip(PAD_IN, PAD_OUT), start=1):
        args += [padded_params[f"w{idx}"], padded_params[f"g{idx}"],
                 padded_params[f"be{idx}"]]
        in_specs += [
            pl.BlockSpec((kin, kout), lambda i: (0, 0)),   # weight, VMEM-resident
            pl.BlockSpec((1, kout), lambda i: (0, 0)),     # gamma
            pl.BlockSpec((1, kout), lambda i: (0, 0)),     # beta
        ]

    out = pl.pallas_call(
        functools.partial(siamese_kernel, n_rows=n, tile_rows=tm,
                          needs_mask=needs_mask, bf16_apply=bf16_apply),
        grid=(n_tiles,),
        in_specs=in_specs,
        out_specs=pl.BlockSpec((tm, OUT_F), lambda i: (i, 0)),
        out_shape=jax.ShapeDtypeStruct((n, OUT_F), jnp.float32),
        compiler_params=pltpu.CompilerParams(
            dimension_semantics=("parallel",),
            vmem_limit_bytes=VMEM_LIMIT_BYTES,
        ),
    )(*args)
    return out


def init_params(key):
    """Synthetic parameters matching the PyTorch module shapes.

    Linear weights are stored transposed: (in, out).  BN gamma/beta are (1, F).
    Linear biases are generated for module fidelity but cancel exactly under
    training-mode BatchNorm, so neither the kernel nor the reference adds them.
    """
    params = {}
    keys = jax.random.split(key, 4 * 4)
    ki = 0
    for idx, (din, dout) in enumerate(DIMS, start=1):
        bound = 1.0 / jnp.sqrt(jnp.float32(din))  # torch Linear default init range
        params[f"w{idx}"] = jax.random.uniform(
            keys[ki], (din, dout), jnp.float32, -bound, bound); ki += 1
        params[f"b{idx}"] = jax.random.uniform(
            keys[ki], (1, dout), jnp.float32, -bound, bound); ki += 1
        params[f"g{idx}"] = 1.0 + 0.1 * jax.random.normal(keys[ki], (1, dout), jnp.float32); ki += 1
        params[f"be{idx}"] = 0.1 * jax.random.normal(keys[ki], (1, dout), jnp.float32); ki += 1
    return params


def siamese_reference(x, raw, *, bf16_apply):
    """Pure-JAX reference: training-mode BN (whole-batch stats), same bf16
    MXU feeds and (optionally) bf16 BN-apply as the kernel.  Linear biases are
    omitted because BN subtracts the batch mean, so they cancel exactly."""
    apply_dtype = jnp.bfloat16 if bf16_apply else jnp.float32

    def bn(h, g, b, leaky, dtype):
        m = jnp.mean(h, axis=0, keepdims=True)
        v = jnp.mean(h * h, axis=0, keepdims=True) - m * m
        scale = g * jax.lax.rsqrt(v + BN_EPS)
        shift = b - m * scale
        z = h.astype(dtype) * scale.astype(dtype) + shift.astype(dtype)
        if leaky:
            z = jnp.maximum(z, LEAKY_SLOPE * z)
        return z

    def fc(h, idx):
        return jnp.dot(h.astype(jnp.bfloat16), raw[f"w{idx}"].astype(jnp.bfloat16),
                       preferred_element_type=jnp.float32)

    h = bn(fc(x, 1), raw["g1"], raw["be1"], True, apply_dtype)
    h = bn(fc(h, 2), raw["g2"], raw["be2"], True, apply_dtype)
    h = bn(fc(h, 3), raw["g3"], raw["be3"], True, apply_dtype)
    z = bn(fc(h, 4), raw["g4"], raw["be4"], False, jnp.float32)
    return jax.nn.sigmoid(z)


if __name__ == "__main__":
    key = jax.random.PRNGKey(0)
    k_x, k_p = jax.random.split(key)

    batch = 8
    x = jax.random.normal(k_x, (batch, IN_F), jnp.float32)
    raw = init_params(k_p)
    padded = prepare_params(raw)

    out = jax.block_until_ready(siamese_forward(x, padded))
    ref = siamese_reference(x, raw, bf16_apply=BF16_APPLY_DEFAULT)

    assert out.shape == (batch, OUT_F)
    err = float(jnp.max(jnp.abs(out - ref)))
    # Tolerance slack covers the bf16 MXU feeds / bf16 BN-apply path and the
    # EUP approximate reciprocal used in the final sigmoid; structural bugs
    # would show up as O(1e-1) errors on these [0, 1] outputs.
    assert jnp.allclose(out, ref, atol=5e-3, rtol=5e-3), \
        f"mismatch vs reference (max abs err {err})"

    print("KERNEL_OK")
</pallas_src>

<mosaic_0001>
module attributes {stable_mosaic.version = 11 : i64} {
  func.func @siamese_kernel(%arg0: i32, %arg1: memref<8x200xf32, #tpu.memory_space<vmem>>, %arg2: memref<200x512xbf16, #tpu.memory_space<vmem>>, %arg3: memref<1x512xf32, #tpu.memory_space<vmem>>, %arg4: memref<1x512xf32, #tpu.memory_space<vmem>>, %arg5: memref<512x256xbf16, #tpu.memory_space<vmem>>, %arg6: memref<1x256xf32, #tpu.memory_space<vmem>>, %arg7: memref<1x256xf32, #tpu.memory_space<vmem>>, %arg8: memref<256x128xbf16, #tpu.memory_space<vmem>>, %arg9: memref<1x128xf32, #tpu.memory_space<vmem>>, %arg10: memref<1x128xf32, #tpu.memory_space<vmem>>, %arg11: memref<128x128xbf16, #tpu.memory_space<vmem>>, %arg12: memref<1x128xf32, #tpu.memory_space<vmem>>, %arg13: memref<1x128xf32, #tpu.memory_space<vmem>>, %arg14: memref<8x2xf32, #tpu.memory_space<vmem>>) attributes {dimension_semantics = [#tpu.dimension_semantics<parallel>], iteration_bounds = array<i64: 1>, scalar_prefetch = 0 : i64, scratch_operands = 0 : i64, tpu.core_type = #tpu.core_type<tc>, window_params = [{transform_indices = @transform_0, window_bounds = array<i64: 8, 200>}, {pipeline_mode = #tpu.pipeline_mode<synchronous>, transform_indices = @transform_1, window_bounds = array<i64: 200, 512>}, {pipeline_mode = #tpu.pipeline_mode<synchronous>, transform_indices = @transform_2, window_bounds = array<i64: 1, 512>}, {pipeline_mode = #tpu.pipeline_mode<synchronous>, transform_indices = @transform_3, window_bounds = array<i64: 1, 512>}, {pipeline_mode = #tpu.pipeline_mode<synchronous>, transform_indices = @transform_4, window_bounds = array<i64: 512, 256>}, {pipeline_mode = #tpu.pipeline_mode<synchronous>, transform_indices = @transform_5, window_bounds = array<i64: 1, 256>}, {pipeline_mode = #tpu.pipeline_mode<synchronous>, transform_indices = @transform_6, window_bounds = array<i64: 1, 256>}, {pipeline_mode = #tpu.pipeline_mode<synchronous>, transform_indices = @transform_7, window_bounds = array<i64: 256, 128>}, {pipeline_mode = #tpu.pipeline_mode<synchronous>, transform_indices = @transform_8, window_bounds = array<i64: 1, 128>}, {pipeline_mode = #tpu.pipeline_mode<synchronous>, transform_indices = @transform_9, window_bounds = array<i64: 1, 128>}, {pipeline_mode = #tpu.pipeline_mode<synchronous>, transform_indices = @transform_10, window_bounds = array<i64: 128, 128>}, {pipeline_mode = #tpu.pipeline_mode<synchronous>, transform_indices = @transform_11, window_bounds = array<i64: 1, 128>}, {pipeline_mode = #tpu.pipeline_mode<synchronous>, transform_indices = @transform_12, window_bounds = array<i64: 1, 128>}, {transform_indices = @transform_13, window_bounds = array<i64: 8, 2>}]} {
    %c0 = arith.constant 0 : index
    %c0_0 = arith.constant 0 : index
    %0 = vector.load %arg1[%c0, %c0_0] : memref<8x200xf32, #tpu.memory_space<vmem>>, vector<8x200xf32>
    %1 = arith.truncf %0 : vector<8x200xf32> to vector<8x200xbf16>
    %c0_1 = arith.constant 0 : index
    %c0_2 = arith.constant 0 : index
    %2 = vector.load %arg2[%c0_1, %c0_2] : memref<200x512xbf16, #tpu.memory_space<vmem>>, vector<200x512xbf16>
    %cst = arith.constant dense<0.000000e+00> : vector<8x512xf32>
    %3 = tpu.matmul %1, %2, %cst {dimension_numbers = #tpu.dot_dimension_numbers<[1], [0], [0], [1], [0, 0, 1, 1], [], []>} : vector<8x200xbf16>, vector<200x512xbf16>, vector<8x512xf32> -> vector<8x512xf32>
    %c0_3 = arith.constant 0 : index
    %c0_4 = arith.constant 0 : index
    %4 = vector.load %arg3[%c0_3, %c0_4] : memref<1x512xf32, #tpu.memory_space<vmem>>, vector<1x512xf32>
    %c0_5 = arith.constant 0 : index
    %c0_6 = arith.constant 0 : index
    %5 = vector.load %arg4[%c0_5, %c0_6] : memref<1x512xf32, #tpu.memory_space<vmem>>, vector<1x512xf32>
    %cst_7 = arith.constant dense<0.000000e+00> : vector<512xf32>
    %6 = vector.multi_reduction <add>, %3, %cst_7 [0] : vector<8x512xf32> to vector<512xf32>
    %7 = vector.shape_cast %6 : vector<512xf32> to vector<1x512xf32>
    %8 = arith.mulf %3, %3 : vector<8x512xf32>
    %cst_8 = arith.constant dense<0.000000e+00> : vector<512xf32>
    %9 = vector.multi_reduction <add>, %8, %cst_8 [0] : vector<8x512xf32> to vector<512xf32>
    %10 = vector.shape_cast %9 : vector<512xf32> to vector<1x512xf32>
    %cst_9 = arith.constant 1.250000e-01 : f32
    %11 = vector.broadcast %cst_9 : f32 to vector<1x512xf32>
    %12 = arith.mulf %7, %11 : vector<1x512xf32>
    %cst_10 = arith.constant 1.250000e-01 : f32
    %13 = vector.broadcast %cst_10 : f32 to vector<1x512xf32>
    %14 = arith.mulf %10, %13 : vector<1x512xf32>
    %15 = arith.mulf %12, %12 : vector<1x512xf32>
    %16 = arith.subf %14, %15 : vector<1x512xf32>
    %cst_11 = arith.constant 9.99999974E-6 : f32
    %17 = vector.broadcast %cst_11 : f32 to vector<1x512xf32>
    %18 = arith.addf %16, %17 : vector<1x512xf32>
    %19 = math.rsqrt %18 : vector<1x512xf32>
    %20 = arith.mulf %4, %19 : vector<1x512xf32>
    %21 = arith.mulf %12, %20 : vector<1x512xf32>
    %22 = arith.subf %5, %21 : vector<1x512xf32>
    %23 = arith.truncf %3 : vector<8x512xf32> to vector<8x512xbf16>
    %24 = arith.truncf %20 : vector<1x512xf32> to vector<1x512xbf16>
    %25 = vector.broadcast %24 : vector<1x512xbf16> to vector<8x512xbf16>
    %26 = arith.mulf %23, %25 : vector<8x512xbf16>
    %27 = arith.truncf %22 : vector<1x512xf32> to vector<1x512xbf16>
    %28 = vector.broadcast %27 : vector<1x512xbf16> to vector<8x512xbf16>
    %29 = arith.addf %26, %28 : vector<8x512xbf16>
    %cst_12 = arith.constant 1.000980e-02 : bf16
    %30 = vector.broadcast %cst_12 : bf16 to vector<8x512xbf16>
    %31 = arith.mulf %30, %29 : vector<8x512xbf16>
    %32 = arith.maximumf %29, %31 : vector<8x512xbf16>
    %c0_13 = arith.constant 0 : index
    %c0_14 = arith.constant 0 : index
    %33 = vector.load %arg5[%c0_13, %c0_14] : memref<512x256xbf16, #tpu.memory_space<vmem>>, vector<512x256xbf16>
    %cst_15 = arith.constant dense<0.000000e+00> : vector<8x256xf32>
    %34 = tpu.matmul %32, %33, %cst_15 {dimension_numbers = #tpu.dot_dimension_numbers<[1], [0], [0], [1], [0, 0, 1, 1], [], []>} : vector<8x512xbf16>, vector<512x256xbf16>, vector<8x256xf32> -> vector<8x256xf32>
    %c0_16 = arith.constant 0 : index
    %c0_17 = arith.constant 0 : index
    %35 = vector.load %arg6[%c0_16, %c0_17] : memref<1x256xf32, #tpu.memory_space<vmem>>, vector<1x256xf32>
    %c0_18 = arith.constant 0 : index
    %c0_19 = arith.constant 0 : index
    %36 = vector.load %arg7[%c0_18, %c0_19] : memref<1x256xf32, #tpu.memory_space<vmem>>, vector<1x256xf32>
    %cst_20 = arith.constant dense<0.000000e+00> : vector<256xf32>
    %37 = vector.multi_reduction <add>, %34, %cst_20 [0] : vector<8x256xf32> to vector<256xf32>
    %38 = vector.shape_cast %37 : vector<256xf32> to vector<1x256xf32>
    %39 = arith.mulf %34, %34 : vector<8x256xf32>
    %cst_21 = arith.constant dense<0.000000e+00> : vector<256xf32>
    %40 = vector.multi_reduction <add>, %39, %cst_21 [0] : vector<8x256xf32> to vector<256xf32>
    %41 = vector.shape_cast %40 : vector<256xf32> to vector<1x256xf32>
    %cst_22 = arith.constant 1.250000e-01 : f32
    %42 = vector.broadcast %cst_22 : f32 to vector<1x256xf32>
    %43 = arith.mulf %38, %42 : vector<1x256xf32>
    %cst_23 = arith.constant 1.250000e-01 : f32
    %44 = vector.broadcast %cst_23 : f32 to vector<1x256xf32>
    %45 = arith.mulf %41, %44 : vector<1x256xf32>
    %46 = arith.mulf %43, %43 : vector<1x256xf32>
    %47 = arith.subf %45, %46 : vector<1x256xf32>
    %cst_24 = arith.constant 9.99999974E-6 : f32
    %48 = vector.broadcast %cst_24 : f32 to vector<1x256xf32>
    %49 = arith.addf %47, %48 : vector<1x256xf32>
    %50 = math.rsqrt %49 : vector<1x256xf32>
    %51 = arith.mulf %35, %50 : vector<1x256xf32>
    %52 = arith.mulf %43, %51 : vector<1x256xf32>
    %53 = arith.subf %36, %52 : vector<1x256xf32>
    %54 = arith.truncf %34 : vector<8x256xf32> to vector<8x256xbf16>
    %55 = arith.truncf %51 : vector<1x256xf32> to vector<1x256xbf16>
    %56 = vector.broadcast %55 : vector<1x256xbf16> to vector<8x256xbf16>
    %57 = arith.mulf %54, %56 : vector<8x256xbf16>
    %58 = arith.truncf %53 : vector<1x256xf32> to vector<1x256xbf16>
    %59 = vector.broadcast %58 : vector<1x256xbf16> to vector<8x256xbf16>
    %60 = arith.addf %57, %59 : vector<8x256xbf16>
    %cst_25 = arith.constant 1.000980e-02 : bf16
    %61 = vector.broadcast %cst_25 : bf16 to vector<8x256xbf16>
    %62 = arith.mulf %61, %60 : vector<8x256xbf16>
    %63 = arith.maximumf %60, %62 : vector<8x256xbf16>
    %c0_26 = arith.constant 0 : index
    %c0_27 = arith.constant 0 : index
    %64 = vector.load %arg8[%c0_26, %c0_27] : memref<256x128xbf16, #tpu.memory_space<vmem>>, vector<256x128xbf16>
    %cst_28 = arith.constant dense<0.000000e+00> : vector<8x128xf32>
    %65 = tpu.matmul %63, %64, %cst_28 {dimension_numbers = #tpu.dot_dimension_numbers<[1], [0], [0], [1], [0, 0, 1, 1], [], []>} : vector<8x256xbf16>, vector<256x128xbf16>, vector<8x128xf32> -> vector<8x128xf32>
    %c0_29 = arith.constant 0 : index
    %c0_30 = arith.constant 0 : index
    %66 = vector.load %arg9[%c0_29, %c0_30] : memref<1x128xf32, #tpu.memory_space<vmem>>, vector<1x128xf32>
    %c0_31 = arith.constant 0 : index
    %c0_32 = arith.constant 0 : index
    %67 = vector.load %arg10[%c0_31, %c0_32] : memref<1x128xf32, #tpu.memory_space<vmem>>, vector<1x128xf32>
    %cst_33 = arith.constant dense<0.000000e+00> : vector<128xf32>
    %68 = vector.multi_reduction <add>, %65, %cst_33 [0] : vector<8x128xf32> to vector<128xf32>
    %69 = vector.shape_cast %68 : vector<128xf32> to vector<1x128xf32>
    %70 = arith.mulf %65, %65 : vector<8x128xf32>
    %cst_34 = arith.constant dense<0.000000e+00> : vector<128xf32>
    %71 = vector.multi_reduction <add>, %70, %cst_34 [0] : vector<8x128xf32> to vector<128xf32>
    %72 = vector.shape_cast %71 : vector<128xf32> to vector<1x128xf32>
    %cst_35 = arith.constant 1.250000e-01 : f32
    %73 = vector.broadcast %cst_35 : f32 to vector<1x128xf32>
    %74 = arith.mulf %69, %73 : vector<1x128xf32>
    %cst_36 = arith.constant 1.250000e-01 : f32
    %75 = vector.broadcast %cst_36 : f32 to vector<1x128xf32>
    %76 = arith.mulf %72, %75 : vector<1x128xf32>
    %77 = arith.mulf %74, %74 : vector<1x128xf32>
    %78 = arith.subf %76, %77 : vector<1x128xf32>
    %cst_37 = arith.constant 9.99999974E-6 : f32
    %79 = vector.broadcast %cst_37 : f32 to vector<1x128xf32>
    %80 = arith.addf %78, %79 : vector<1x128xf32>
    %81 = math.rsqrt %80 : vector<1x128xf32>
    %82 = arith.mulf %66, %81 : vector<1x128xf32>
    %83 = arith.mulf %74, %82 : vector<1x128xf32>
    %84 = arith.subf %67, %83 : vector<1x128xf32>
    %85 = arith.truncf %65 : vector<8x128xf32> to vector<8x128xbf16>
    %86 = arith.truncf %82 : vector<1x128xf32> to vector<1x128xbf16>
    %87 = vector.broadcast %86 : vector<1x128xbf16> to vector<8x128xbf16>
    %88 = arith.mulf %85, %87 : vector<8x128xbf16>
    %89 = arith.truncf %84 : vector<1x128xf32> to vector<1x128xbf16>
    %90 = vector.broadcast %89 : vector<1x128xbf16> to vector<8x128xbf16>
    %91 = arith.addf %88, %90 : vector<8x128xbf16>
    %cst_38 = arith.constant 1.000980e-02 : bf16
    %92 = vector.broadcast %cst_38 : bf16 to vector<8x128xbf16>
    %93 = arith.mulf %92, %91 : vector<8x128xbf16>
    %94 = arith.maximumf %91, %93 : vector<8x128xbf16>
    %c0_39 = arith.constant 0 : index
    %c0_40 = arith.constant 0 : index
    %95 = vector.load %arg11[%c0_39, %c0_40] : memref<128x128xbf16, #tpu.memory_space<vmem>>, vector<128x128xbf16>
    %cst_41 = arith.constant dense<0.000000e+00> : vector<8x128xf32>
    %96 = tpu.matmul %94, %95, %cst_41 {dimension_numbers = #tpu.dot_dimension_numbers<[1], [0], [0], [1], [0, 0, 1, 1], [], []>} : vector<8x128xbf16>, vector<128x128xbf16>, vector<8x128xf32> -> vector<8x128xf32>
    %c0_42 = arith.constant 0 : index
    %c0_43 = arith.constant 0 : index
    %97 = vector.load %arg12[%c0_42, %c0_43] : memref<1x128xf32, #tpu.memory_space<vmem>>, vector<1x128xf32>
    %c0_44 = arith.constant 0 : index
    %c0_45 = arith.constant 0 : index
    %98 = vector.load %arg13[%c0_44, %c0_45] : memref<1x128xf32, #tpu.memory_space<vmem>>, vector<1x128xf32>
    %cst_46 = arith.constant dense<0.000000e+00> : vector<128xf32>
    %99 = vector.multi_reduction <add>, %96, %cst_46 [0] : vector<8x128xf32> to vector<128xf32>
    %100 = vector.shape_cast %99 : vector<128xf32> to vector<1x128xf32>
    %101 = arith.mulf %96, %96 : vector<8x128xf32>
    %cst_47 = arith.constant dense<0.000000e+00> : vector<128xf32>
    %102 = vector.multi_reduction <add>, %101, %cst_47 [0] : vector<8x128xf32> to vector<128xf32>
    %103 = vector.shape_cast %102 : vector<128xf32> to vector<1x128xf32>
    %cst_48 = arith.constant 1.250000e-01 : f32
    %104 = vector.broadcast %cst_48 : f32 to vector<1x128xf32>
    %105 = arith.mulf %100, %104 : vector<1x128xf32>
    %cst_49 = arith.constant 1.250000e-01 : f32
    %106 = vector.broadcast %cst_49 : f32 to vector<1x128xf32>
    %107 = arith.mulf %103, %106 : vector<1x128xf32>
    %108 = arith.mulf %105, %105 : vector<1x128xf32>
    %109 = arith.subf %107, %108 : vector<1x128xf32>
    %cst_50 = arith.constant 9.99999974E-6 : f32
    %110 = vector.broadcast %cst_50 : f32 to vector<1x128xf32>
    %111 = arith.addf %109, %110 : vector<1x128xf32>
    %112 = math.rsqrt %111 : vector<1x128xf32>
    %113 = arith.mulf %97, %112 : vector<1x128xf32>
    %114 = arith.mulf %105, %113 : vector<1x128xf32>
    %115 = arith.subf %98, %114 : vector<1x128xf32>
    %116 = vector.extract_strided_slice %96 {offsets = [0, 0], sizes = [8, 2], strides = [1, 1]} : vector<8x128xf32> to vector<8x2xf32>
    %117 = vector.extract_strided_slice %113 {offsets = [0, 0], sizes = [1, 2], strides = [1, 1]} : vector<1x128xf32> to vector<1x2xf32>
    %118 = vector.broadcast %117 : vector<1x2xf32> to vector<8x2xf32>
    %119 = arith.mulf %116, %118 : vector<8x2xf32>
    %120 = vector.extract_strided_slice %115 {offsets = [0, 0], sizes = [1, 2], strides = [1, 1]} : vector<1x128xf32> to vector<1x2xf32>
    %121 = vector.broadcast %120 : vector<1x2xf32> to vector<8x2xf32>
    %122 = arith.addf %119, %121 : vector<8x2xf32>
    %cst_51 = arith.constant 0.000000e+00 : f32
    %123 = vector.broadcast %cst_51 : f32 to vector<8x2xf32>
    %124 = arith.subf %123, %122 : vector<8x2xf32>
    %125 = math.exp %124 : vector<8x2xf32>
    %cst_52 = arith.constant 1.000000e+00 : f32
    %126 = vector.broadcast %cst_52 : f32 to vector<8x2xf32>
    %127 = arith.addf %126, %125 : vector<8x2xf32>
    %128 = tpu.reciprocal %127 {approx = true} : vector<8x2xf32> -> vector<8x2xf32>
    %c0_53 = arith.constant 0 : index
    %c0_54 = arith.constant 0 : index
    %129 = vector.load %arg14[%c0_53, %c0_54] : memref<8x2xf32, #tpu.memory_space<vmem>>, vector<8x2xf32>
    tpu.vector_store %arg14[%c0_53, %c0_54], %128 {strides = array<i32>} : memref<8x2xf32, #tpu.memory_space<vmem>>, vector<8x2xf32>,
    return
  }
  func.func @transform_0(%arg0: i32) -> (i32, i32) {
    %c0_i32 = arith.constant 0 : i32
    %c0_i32_0 = arith.constant 0 : i32
    return %arg0, %c0_i32 : i32, i32
  }
  func.func @transform_1(%arg0: i32) -> (i32, i32) {
    %c0_i32 = arith.constant 0 : i32
    %c0_i32_0 = arith.constant 0 : i32
    %c0_i32_1 = arith.constant 0 : i32
    return %c0_i32, %c0_i32_0 : i32, i32
  }
  func.func @transform_2(%arg0: i32) -> (i32, i32) {
    %c0_i32 = arith.constant 0 : i32
    %c0_i32_0 = arith.constant 0 : i32
    %c0_i32_1 = arith.constant 0 : i32
    return %c0_i32, %c0_i32_0 : i32, i32
  }
  func.func @transform_3(%arg0: i32) -> (i32, i32) {
    %c0_i32 = arith.constant 0 : i32
    %c0_i32_0 = arith.constant 0 : i32
    %c0_i32_1 = arith.constant 0 : i32
    return %c0_i32, %c0_i32_0 : i32, i32
  }
  func.func @transform_4(%arg0: i32) -> (i32, i32) {
    %c0_i32 = arith.constant 0 : i32
    %c0_i32_0 = arith.constant 0 : i32
    %c0_i32_1 = arith.constant 0 : i32
    return %c0_i32, %c0_i32_0 : i32, i32
  }
  func.func @transform_5(%arg0: i32) -> (i32, i32) {
    %c0_i32 = arith.constant 0 : i32
    %c0_i32_0 = arith.constant 0 : i32
    %c0_i32_1 = arith.constant 0 : i32
    return %c0_i32, %c0_i32_0 : i32, i32
  }
  func.func @transform_6(%arg0: i32) -> (i32, i32) {
    %c0_i32 = arith.constant 0 : i32
    %c0_i32_0 = arith.constant 0 : i32
    %c0_i32_1 = arith.constant 0 : i32
    return %c0_i32, %c0_i32_0 : i32, i32
  }
  func.func @transform_7(%arg0: i32) -> (i32, i32) {
    %c0_i32 = arith.constant 0 : i32
    %c0_i32_0 = arith.constant 0 : i32
    %c0_i32_1 = arith.constant 0 : i32
    return %c0_i32, %c0_i32_0 : i32, i32
  }
  func.func @transform_8(%arg0: i32) -> (i32, i32) {
    %c0_i32 = arith.constant 0 : i32
    %c0_i32_0 = arith.constant 0 : i32
    %c0_i32_1 = arith.constant 0 : i32
    return %c0_i32, %c0_i32_0 : i32, i32
  }
  func.func @transform_9(%arg0: i32) -> (i32, i32) {
    %c0_i32 = arith.constant 0 : i32
    %c0_i32_0 = arith.constant 0 : i32
    %c0_i32_1 = arith.constant 0 : i32
    return %c0_i32, %c0_i32_0 : i32, i32
  }
  func.func @transform_10(%arg0: i32) -> (i32, i32) {
    %c0_i32 = arith.constant 0 : i32
    %c0_i32_0 = arith.constant 0 : i32
    %c0_i32_1 = arith.constant 0 : i32
    return %c0_i32, %c0_i32_0 : i32, i32
  }
  func.func @transform_11(%arg0: i32) -> (i32, i32) {
    %c0_i32 = arith.constant 0 : i32
    %c0_i32_0 = arith.constant 0 : i32
    %c0_i32_1 = arith.constant 0 : i32
    return %c0_i32, %c0_i32_0 : i32, i32
  }
  func.func @transform_12(%arg0: i32) -> (i32, i32) {
    %c0_i32 = arith.constant 0 : i32
    %c0_i32_0 = arith.constant 0 : i32
    %c0_i32_1 = arith.constant 0 : i32
    return %c0_i32, %c0_i32_0 : i32, i32
  }
  func.func @transform_13(%arg0: i32) -> (i32, i32) {
    %c0_i32 = arith.constant 0 : i32
    %c0_i32_0 = arith.constant 0 : i32
    return %arg0, %c0_i32 : i32, i32
  }
}

</mosaic_0001>

<bundles_post_ra>
// kernel: tpu_custom_call.1
= control target key start
LH: loop header
LB: loop body
LE: loop exit
PB: predicated region body
PF: predicated region fallthrough
CT: control target
= control target key end

     0   :  { %18 = vsyncpa [#allocation3], 0  ;;  %s2591_s0 = inlined_call_operand.hbm [shape: f32[8,200], index: 0, kind: input, shape index: {}]   ;;  %s2592_s1 = inlined_call_operand.hbm [shape: bf16[200,512], index: 1, kind: input, shape index: {}]   ;;  %s2593_s2 = inlined_call_operand.vmem [shape: f32[1,512], index: 2, kind: input, shape index: {}]   ;;  %s2594_s3 = inlined_call_operand.vmem [shape: f32[1,512], index: 3, kind: input, shape index: {}]   ;;  %s2595_s4 = inlined_call_operand.hbm [shape: bf16[512,256], index: 4, kind: input, shape index: {}]   ;;  %s2596_s5 = inlined_call_operand.vmem [shape: f32[1,256], index: 5, kind: input, shape index: {}]   ;;  %s2597_s6 = inlined_call_operand.vmem [shape: f32[1,256], index: 6, kind: input, shape index: {}]   ;;  %s2598_s7 = inlined_call_operand.hbm [shape: bf16[256,128], index: 7, kind: input, shape index: {}]   ;;  %s2599_s8 = inlined_call_operand.vmem [shape: f32[1,128], index: 8, kind: input, shape index: {}]   ;;  %s2600_s9 = inlined_call_operand.vmem [shape: f32[1,128], index: 9, kind: input, shape index: {}]   ;;  %s2601_s10 = inlined_call_operand.hbm [shape: bf16[128,128], index: 10, kind: input, shape index: {}]   ;;  %s2602_s11 = inlined_call_operand.vmem [shape: f32[1,128], index: 11, kind: input, shape index: {}]   ;;  %s2603_s12 = inlined_call_operand.vmem [shape: f32[1,128], index: 12, kind: input, shape index: {}]   ;;  %s2604_s13 = inlined_call_operand.vmem [shape: f32[8,2], index: 13, kind: output, shape index: {}]  }
   0x1   :  { %19 = vsyncpa [#allocation5], 0 }
   0x2   :  { %20 = vsyncpa [#allocation8], 0  ;;  %s2307_s25 = smov [#allocation4]   ;;  %s2191_s29 = scalar_lea.hbm %s2592_s1, 6400 }
   0x3   :  { %s36_s26 = sshll.u32 %s2307_s25, 4  ;;  %p2192_p0 = scmp.ne.s32.totalorder %s2592_s1, %s2191_s29  ;;  %s37_s26 = int_to_ptr.vmem [resolvable:$true] %s36_s26 }
   0x4   :  { %p2195_p1 = scmp.lt.u32.totalorder %s2191_s29, %s2592_s1 }
   0x6   :  { %p2197_p2 = pnand %p2195_p1, %p2192_p0 }
   0x8   :  { %2200 = shalt.err (!%p2197_p2)
}
   0x9   :  { %s2201_s17 = scalar_lea.vmem %s37_s26, 6400  ;;  %p2206_p4 = scmp.lt.s32.totalorder %s37_s26, %s37_s26 }
   0xa   :  { %p2202_p3 = scmp.ne.s32.totalorder %s37_s26, %s2201_s17  ;;  %p2207_p5 = scmp.lt.s32.totalorder %s2201_s17, %s2201_s17 }
   0xc   :  { %p2208_p6 = por %p2207_p5, %p2206_p4 }
   0xe   :  { %p2209_p7 = pnand %p2208_p6, %p2202_p3 }
  0x10   :  { %2212 = shalt.err (!%p2209_p7)
}
  0x11   :  { %s2308_s18 = smov 256   ;;  %s2309_s19 = smov 16  }
  0x12   :  { %42 = dma.hbm_to_vmem [thread:$0]  %s2592_s1, 6400, %s37_s26, [#allocation5], %s2308_s18, %s2308_s18, %s2309_s19  }
  0x13   :  { %s2310_s22 = smov [#allocation7]   ;;  %s2213_s27 = scalar_lea.hbm %s2598_s7, 2048 }
  0x14   :  { %s68_s23 = sshll.u32 %s2310_s22, 4  ;;  %p2214_p8 = scmp.ne.s32.totalorder %s2598_s7, %s2213_s27  ;;  %s69_s23 = int_to_ptr.vmem [resolvable:$true] %s68_s23 }
  0x15   :  { %p2217_p9 = scmp.lt.u32.totalorder %s2213_s27, %s2598_s7 }
  0x17   :  { %p2219_p10 = pnand %p2217_p9, %p2214_p8 }
  0x19   :  { %2222 = shalt.err (!%p2219_p10)
}
  0x1a   :  { %s2223_s15 = scalar_lea.vmem %s69_s23, 2048  ;;  %p2228_p12 = scmp.lt.s32.totalorder %s69_s23, %s69_s23 }
  0x1b   :  { %p2224_p11 = scmp.ne.s32.totalorder %s69_s23, %s2223_s15  ;;  %p2229_p13 = scmp.lt.s32.totalorder %s2223_s15, %s2223_s15 }
  0x1d   :  { %p2230_p0 = por %p2229_p13, %p2228_p12 }
  0x1f   :  { %p2231_p1 = pnand %p2230_p0, %p2224_p11 }
  0x21   :  { %2234 = shalt.err (!%p2231_p1)
}
  0x22   :  { %s2311_s1 = smov 64   ;;  %s2312_s26 = smov 4  }
  0x23   :  { %74 = dma.hbm_to_vmem [thread:$0]  %s2598_s7, 2048, %s69_s23, [#allocation8], %s2311_s1, %s2311_s1, %s2312_s26  }
  0x24   :  { %s2313_s18 = smov [#allocation2]   ;;  %s2314_s20 = smov [#allocation6]  }
  0x25   :  { %s27_s19 = sshll.u32 %s2313_s18, 4  ;;  %s52_s21 = sshll.u32 %s2314_s20, 4  ;;  %s28_s19 = int_to_ptr.vmem [resolvable:$true] %s27_s19  ;;  %s2418_s21 = int_to_ptr.vmem [resolvable:$true] %s52_s21 }
  0x26   :  { %s2235_s25 = scalar_lea.hbm %s2591_s0, 256 }
  0x27   :  { %p2236_p2 = scmp.ne.s32.totalorder %s2591_s0, %s2235_s25  ;;  %p2239_p3 = scmp.lt.u32.totalorder %s2235_s25, %s2591_s0 }
  0x29   :  { %p2241_p4 = pnand %p2239_p3, %p2236_p2 }
  0x2b   :  { %2244 = shalt.err (!%p2241_p4)
}
  0x2c   :  { %s2245_s7 = scalar_lea.vmem %s28_s19, 256  ;;  %p2250_p6 = scmp.lt.s32.totalorder %s28_s19, %s28_s19 }
  0x2d   :  { %p2246_p5 = scmp.ne.s32.totalorder %s28_s19, %s2245_s7  ;;  %p2251_p7 = scmp.lt.s32.totalorder %s2245_s7, %s2245_s7 }
  0x2f   :  { %p2252_p8 = por %p2251_p7, %p2250_p6 }
  0x31   :  { %p2253_p9 = pnand %p2252_p8, %p2246_p5 }
  0x33   :  { %2256 = shalt.err (!%p2253_p9)
}
  0x34   :  { %30 = dma.hbm_to_vmem [thread:$0]  %s2591_s0, 256, %s28_s19, [#allocation3]  }
  0x35   :  { %s2257_s17 = scalar_lea.hbm %s2595_s4, 8192 }
  0x36   :  { %p2258_p10 = scmp.ne.s32.totalorder %s2595_s4, %s2257_s17  ;;  %p2261_p11 = scmp.lt.u32.totalorder %s2257_s17, %s2595_s4 }
  0x38   :  { %p2263_p12 = pnand %p2261_p11, %p2258_p10 }
  0x3a   :  { %2266 = shalt.err (!%p2263_p12)
}
  0x3b   :  { %s2267_s25 = scalar_lea.vmem %s2418_s21, 8192  ;;  %p2272_p0 = scmp.lt.s32.totalorder %s2418_s21, %s2418_s21 }
  0x3c   :  { %p2268_p13 = scmp.ne.s32.totalorder %s2418_s21, %s2267_s25  ;;  %p2273_p1 = scmp.lt.s32.totalorder %s2267_s25, %s2267_s25 }
  0x3e   :  { %p2274_p2 = por %p2273_p1, %p2272_p0 }
  0x40   :  { %p2275_p3 = pnand %p2274_p2, %p2268_p13 }
  0x42   :  { %2278 = shalt.err (!%p2275_p3)
}
  0x43   :  { %s2315_s0 = smov 128   ;;  %s2316_s19 = smov 8  }
  0x44   :  { %58 = dma.hbm_to_vmem [thread:$0]  %s2595_s4, 8192, %s2418_s21, [#allocation5], %s2315_s0, %s2315_s0, %s2316_s19  }
  0x45   :  { %s2317_s29 = smov [#allocation9]   ;;  %s2279_s14 = scalar_lea.hbm %s2601_s10, 1024 }
  0x46   :  { %s84_s30 = sshll.u32 %s2317_s29, 4  ;;  %p2280_p4 = scmp.ne.s32.totalorder %s2601_s10, %s2279_s14  ;;  %s85_s30 = int_to_ptr.vmem [resolvable:$true] %s84_s30 }
  0x47   :  { %p2283_p5 = scmp.lt.u32.totalorder %s2279_s14, %s2601_s10 }
  0x49   :  { %p2285_p6 = pnand %p2283_p5, %p2280_p4 }
  0x4b   :  { %2288 = shalt.err (!%p2285_p6)
}
  0x4c   :  { %s2289_s20 = scalar_lea.vmem %s85_s30, 1024  ;;  %p2294_p8 = scmp.lt.s32.totalorder %s85_s30, %s85_s30 }
  0x4d   :  { %p2290_p7 = scmp.ne.s32.totalorder %s85_s30, %s2289_s20  ;;  %p2295_p9 = scmp.lt.s32.totalorder %s2289_s20, %s2289_s20 }
  0x4f   :  { %p2296_p10 = por %p2295_p9, %p2294_p8 }
  0x51   :  { %p2297_p11 = pnand %p2296_p10, %p2290_p7 }
  0x53   :  { %2300 = shalt.err (!%p2297_p11)
}
  0x54   :  { %90 = dma.hbm_to_vmem [thread:$0]  %s2601_s10, 1024, %s85_s30, [#allocation8], %s2311_s1, %s2311_s1, %s2312_s26  }
  0x55   :  { %2301 = dma.done.wait [#allocation3], 256  }
  0x56   :  { %2302 = vsyncadd [#allocation3], 4294967040 }
  0x57   :  { %2303 = dma.done.wait [#allocation5], 14592  }
  0x58   :  { %2304 = vsyncadd [#allocation5], 4294952704 }
  0x59   :  { %2305 = dma.done.wait [#allocation8], 3072  }
  0x5a   :  { %2306 = vsyncadd [#allocation8], 4294964224  ;;  %v1975_v0 = vld [vmem:[#allocation4 + $0x4] ss:$16 sps:$4 sm:$0xff]   ;;  %v1977_v1 = vld [vmem:[#allocation4] ss:$16 sps:$4 sm:$0xff]  }
  0x5b   :  { %433 = vmatprep.subr.bf16.mxu1 %v1975_v0  ;;  %v1978_v2 = vld [vmem:[#allocation4 + $0x24] ss:$16 sps:$4 sm:$0xff]   ;;  %v1980_v3 = vld [vmem:[#allocation4 + $0x20] ss:$16 sps:$4 sm:$0xff]   ;;  %v113_v11 = vld [vmem:[#allocation2 + $0x8] sm:$0xff]  ;;  %vm416_vm0 = vcmask 588800  }
  0x5c   :  { %434 = vmatpush1.bf16.msra.mxu1 %v1977_v1  ;;  %v1981_v4 = vld [vmem:[#allocation4 + $0x44] ss:$16 sps:$4 sm:$0xff]   ;;  %v1983_v5 = vld [vmem:[#allocation4 + $0x40] ss:$16 sps:$4 sm:$0xff]   ;;  %v115_v12 = vpack.c.bf16 %v113_v11, %v113_v11  ;;  %vm420_vm1 = vcmask 1043456   ;;  %v165_v55 = vld [vmem:[#allocation4 + $0x188] sm:$0xff] }
  0x5d   :  { %435 = vmatprep.subr.bf16.mxu1 %v1978_v2  ;;  %v1984_v6 = vld [vmem:[#allocation4 + $0x64] ss:$16 sps:$4 sm:$0xff]   ;;  %v1986_v7 = vld [vmem:[#allocation4 + $0x60] ss:$16 sps:$4 sm:$0xff]   ;;  %v2015_v30 = vld [vmem:[#allocation4 + $0xc] ss:$16 sps:$4 sm:$0xff]   ;;  %v1813_v57 = vcombine.high %v165_v55, %v165_v55  ;;  %v1812_v58 = vcombine.low %v165_v55, %v165_v55 }
  0x5e   :  { %v1987_v8 = vld [vmem:[#allocation4 + $0x84] ss:$16 sps:$4 sm:$0xff]   ;;  %v1989_v9 = vld [vmem:[#allocation4 + $0x80] ss:$16 sps:$4 sm:$0xff]   ;;  %1815 = vmatprep.mubr.msk.bf16.mxu1 %vm416_vm0, %v115_v12  ;;  %v2013_v32 = vld [vmem:[#allocation4 + $0x8] ss:$16 sps:$4 sm:$0xff]  }
  0x5f   :  { %v1990_v10 = vld [vmem:[#allocation4 + $0xa4] ss:$16 sps:$4 sm:$0xff]   ;;  %v1992_v13 = vld [vmem:[#allocation4 + $0xa0] ss:$16 sps:$4 sm:$0xff]   ;;  %v2018_v34 = vld [vmem:[#allocation4 + $0x2c] ss:$16 sps:$4 sm:$0xff]  }
  0x60   :  { %436 = vmatpush1.bf16.msra.mxu1 %v1980_v3  ;;  %v1993_v14 = vld [vmem:[#allocation4 + $0xc4] ss:$16 sps:$4 sm:$0xff]   ;;  %v1995_v15 = vld [vmem:[#allocation4 + $0xc0] ss:$16 sps:$4 sm:$0xff]   ;;  %v2016_v35 = vld [vmem:[#allocation4 + $0x28] ss:$16 sps:$4 sm:$0xff]  }
  0x61   :  { %437 = vmatprep.subr.bf16.mxu1 %v1981_v4  ;;  %v1996_v16 = vld [vmem:[#allocation4 + $0xe4] ss:$16 sps:$4 sm:$0xff]   ;;  %v1998_v17 = vld [vmem:[#allocation4 + $0xe0] ss:$16 sps:$4 sm:$0xff]   ;;  %v2021_v36 = vld [vmem:[#allocation4 + $0x4c] ss:$16 sps:$4 sm:$0xff]  }
  0x62   :  { %v1999_v18 = vld [vmem:[#allocation4 + $0x104] ss:$16 sps:$4 sm:$0xff]   ;;  %v2001_v19 = vld [vmem:[#allocation4 + $0x100] ss:$16 sps:$4 sm:$0xff]   ;;  %v2019_v37 = vld [vmem:[#allocation4 + $0x48] ss:$16 sps:$4 sm:$0xff]  }
  0x63   :  { %v2002_v20 = vld [vmem:[#allocation4 + $0x124] ss:$16 sps:$4 sm:$0xff]   ;;  %v2004_v21 = vld [vmem:[#allocation4 + $0x120] ss:$16 sps:$4 sm:$0xff]   ;;  %v2024_v38 = vld [vmem:[#allocation4 + $0x6c] ss:$16 sps:$4 sm:$0xff]  }
  0x64   :  { %438 = vmatpush1.bf16.msra.mxu1 %v1983_v5  ;;  %v2005_v22 = vld [vmem:[#allocation4 + $0x144] ss:$16 sps:$4 sm:$0xff]   ;;  %v2007_v23 = vld [vmem:[#allocation4 + $0x140] ss:$16 sps:$4 sm:$0xff]   ;;  %v2022_v39 = vld [vmem:[#allocation4 + $0x68] ss:$16 sps:$4 sm:$0xff]  }
  0x65   :  { %439 = vmatprep.subr.bf16.mxu1 %v1984_v6  ;;  %v2008_v24 = vld [vmem:[#allocation4 + $0x164] ss:$16 sps:$4 sm:$0xff]   ;;  %v2010_v26 = vld [vmem:[#allocation4 + $0x160] ss:$16 sps:$4 sm:$0xff]   ;;  %v2027_v40 = vld [vmem:[#allocation4 + $0x8c] ss:$16 sps:$4 sm:$0xff]  }
  0x66   :  { %v164_v25 = vld [vmem:[#allocation4 + $0x180] sm:$0xff]  ;;  %v112_v29 = vld [vmem:[#allocation2] sm:$0xff]  ;;  %v2025_v41 = vld [vmem:[#allocation4 + $0x88] ss:$16 sps:$4 sm:$0xff]   ;;  %v428_v59 = vsel %vm420_vm1, %v1812_v58, 0  ;;  %vm2320_vm2 = vmmov 0  }
  0x67   :  { %v1811_v27 = vcombine.high %v164_v25, %v164_v25  ;;  %v1810_v28 = vcombine.low %v164_v25, %v164_v25  ;;  %v114_v33 = vpack.c.bf16 %v112_v29, %v112_v29  ;;  %v2030_v42 = vld [vmem:[#allocation4 + $0xac] ss:$16 sps:$4 sm:$0xff]   ;;  %v2028_v43 = vld [vmem:[#allocation4 + $0xa8] ss:$16 sps:$4 sm:$0xff]   ;;  %vm1753_vm3 = vcmask 15360  }
  0x68   :  { %440 = vmatpush1.bf16.msra.mxu1 %v1986_v7  ;;  %v2033_v44 = vld [vmem:[#allocation4 + $0xcc] ss:$16 sps:$4 sm:$0xff]   ;;  %v2031_v45 = vld [vmem:[#allocation4 + $0xc8] ss:$16 sps:$4 sm:$0xff]  }
  0x69   :  { %441 = vmatprep.subr.bf16.mxu1 %v1987_v8  ;;  %v422_v31 = vsel %vm420_vm1, %v1810_v28, 0  ;;  %v2036_v46 = vld [vmem:[#allocation4 + $0xec] ss:$16 sps:$4 sm:$0xff]   ;;  %v2034_v47 = vld [vmem:[#allocation4 + $0xe8] ss:$16 sps:$4 sm:$0xff]  }
  0x6a   :  { %v2039_v48 = vld [vmem:[#allocation4 + $0x10c] ss:$16 sps:$4 sm:$0xff]   ;;  %v2037_v49 = vld [vmem:[#allocation4 + $0x108] ss:$16 sps:$4 sm:$0xff]  }
  0x6b   :  { %v2042_v50 = vld [vmem:[#allocation4 + $0x12c] ss:$16 sps:$4 sm:$0xff]   ;;  %v2040_v51 = vld [vmem:[#allocation4 + $0x128] ss:$16 sps:$4 sm:$0xff]  }
  0x6c   :  { %442 = vmatpush1.bf16.msra.mxu1 %v1989_v9  ;;  %v2045_v52 = vld [vmem:[#allocation4 + $0x14c] ss:$16 sps:$4 sm:$0xff]   ;;  %v2043_v53 = vld [vmem:[#allocation4 + $0x148] ss:$16 sps:$4 sm:$0xff]  }
  0x6d   :  { %443 = vmatprep.subr.bf16.mxu1 %v1990_v10  ;;  %v2048_v54 = vld [vmem:[#allocation4 + $0x16c] ss:$16 sps:$4 sm:$0xff]   ;;  %v2046_v56 = vld [vmem:[#allocation4 + $0x168] ss:$16 sps:$4 sm:$0xff]  }
  0x6e   :  { %v2051_v60 = vld [vmem:[#allocation6 + $0x4] ss:$8 sps:$4 sm:$0xff]   ;;  %v2053_v61 = vld [vmem:[#allocation6] ss:$8 sps:$4 sm:$0xff]   ;;  %v2054_v62 = vld [vmem:[#allocation6 + $0x14] ss:$8 sps:$4 sm:$0xff]  }
  0x6f   :  { %1167 = vmatprep.subr.bf16.mxu0 %v2051_v60  ;;  %v2056_v63 = vld [vmem:[#allocation6 + $0x10] ss:$8 sps:$4 sm:$0xff]   ;;  %v2057_v0 = vld [vmem:[#allocation6 + $0x24] ss:$8 sps:$4 sm:$0xff]   ;;  %v2059_v1 = vld [vmem:[#allocation6 + $0x20] ss:$8 sps:$4 sm:$0xff]  }
  0x70   :  { %444 = vmatpush1.bf16.msra.mxu1 %v1992_v13  ;;  %1168 = vmatpush1.bf16.msra.mxu0 %v2053_v61  ;;  %v2060_v2 = vld [vmem:[#allocation6 + $0x34] ss:$8 sps:$4 sm:$0xff]   ;;  %v2062_v3 = vld [vmem:[#allocation6 + $0x30] ss:$8 sps:$4 sm:$0xff]   ;;  %v2063_v4 = vld [vmem:[#allocation6 + $0x44] ss:$8 sps:$4 sm:$0xff]  }
  0x71   :  { %445 = vmatprep.subr.bf16.mxu1 %v1993_v14  ;;  %1169 = vmatprep.subr.bf16.mxu0 %v2054_v62  ;;  %v2065_v5 = vld [vmem:[#allocation6 + $0x40] ss:$8 sps:$4 sm:$0xff]   ;;  %v2066_v6 = vld [vmem:[#allocation6 + $0x54] ss:$8 sps:$4 sm:$0xff]   ;;  %v2068_v7 = vld [vmem:[#allocation6 + $0x50] ss:$8 sps:$4 sm:$0xff]  }
  0x72   :  { %v2069_v8 = vld [vmem:[#allocation6 + $0x64] ss:$8 sps:$4 sm:$0xff]   ;;  %v2071_v9 = vld [vmem:[#allocation6 + $0x60] ss:$8 sps:$4 sm:$0xff]   ;;  %v2072_v10 = vld [vmem:[#allocation6 + $0x74] ss:$8 sps:$4 sm:$0xff]  }
  0x73   :  { %v2074_v11 = vld [vmem:[#allocation6 + $0x70] ss:$8 sps:$4 sm:$0xff]   ;;  %v2077_v13 = vld [vmem:[#allocation6 + $0x80] ss:$8 sps:$4 sm:$0xff]   ;;  %v2078_v14 = vld [vmem:[#allocation6 + $0x94] ss:$8 sps:$4 sm:$0xff]  }
  0x74   :  { %446 = vmatpush1.bf16.msra.mxu1 %v1995_v15  ;;  %1170 = vmatpush1.bf16.msra.mxu0 %v2056_v63  ;;  %v2080_v15 = vld [vmem:[#allocation6 + $0x90] ss:$8 sps:$4 sm:$0xff]   ;;  %v2095_v25 = vld [vmem:[#allocation6 + $0xe0] ss:$8 sps:$4 sm:$0xff]   ;;  %v2101_v28 = vld [vmem:[#allocation6 + $0x104] ss:$8 sps:$4 sm:$0xff]  }
  0x75   :  { %447 = vmatprep.subr.bf16.mxu1 %v1996_v16  ;;  %1171 = vmatprep.subr.bf16.mxu0 %v2057_v0  ;;  %v2081_v16 = vld [vmem:[#allocation6 + $0xa4] ss:$8 sps:$4 sm:$0xff]  }
  0x78   :  { %448 = vmatpush1.bf16.msra.mxu1 %v1998_v17  ;;  %1172 = vmatpush1.bf16.msra.mxu0 %v2059_v1  ;;  %v2083_v17 = vld [vmem:[#allocation6 + $0xa0] ss:$8 sps:$4 sm:$0xff]  }
  0x79   :  { %449 = vmatprep.subr.bf16.mxu1 %v1999_v18  ;;  %1173 = vmatprep.subr.bf16.mxu0 %v2060_v2  ;;  %v2084_v18 = vld [vmem:[#allocation6 + $0xb4] ss:$8 sps:$4 sm:$0xff]  }
  0x7c   :  { %450 = vmatpush1.bf16.msra.mxu1 %v2001_v19  ;;  %1174 = vmatpush1.bf16.msra.mxu0 %v2062_v3  ;;  %v2086_v19 = vld [vmem:[#allocation6 + $0xb0] ss:$8 sps:$4 sm:$0xff]  }
  0x7d   :  { %451 = vmatprep.subr.bf16.mxu1 %v2002_v20  ;;  %1175 = vmatprep.subr.bf16.mxu0 %v2063_v4  ;;  %v2087_v20 = vld [vmem:[#allocation6 + $0xc4] ss:$8 sps:$4 sm:$0xff]  }
  0x80   :  { %452 = vmatpush1.bf16.msra.mxu1 %v2004_v21  ;;  %1176 = vmatpush1.bf16.msra.mxu0 %v2065_v5  ;;  %v2089_v21 = vld [vmem:[#allocation6 + $0xc0] ss:$8 sps:$4 sm:$0xff]  }
  0x81   :  { %453 = vmatprep.subr.bf16.mxu1 %v2005_v22  ;;  %1177 = vmatprep.subr.bf16.mxu0 %v2066_v6  ;;  %v2090_v22 = vld [vmem:[#allocation6 + $0xd4] ss:$8 sps:$4 sm:$0xff]  }
  0x84   :  { %454 = vmatpush1.bf16.msra.mxu1 %v2007_v23  ;;  %1178 = vmatpush1.bf16.msra.mxu0 %v2068_v7  ;;  %v2092_v23 = vld [vmem:[#allocation6 + $0xd0] ss:$8 sps:$4 sm:$0xff]  }
  0x85   :  { %455 = vmatprep.subr.bf16.mxu1 %v2008_v24  ;;  %1179 = vmatprep.subr.bf16.mxu0 %v2069_v8  ;;  %v2093_v24 = vld [vmem:[#allocation6 + $0xe4] ss:$8 sps:$4 sm:$0xff]  }
  0x88   :  { %456 = vmatpush1.bf16.msra.mxu1 %v2010_v26  ;;  %1180 = vmatpush1.bf16.msra.mxu0 %v2071_v9  ;;  %v2096_v26 = vld [vmem:[#allocation6 + $0xf4] ss:$8 sps:$4 sm:$0xff]  }
  0x89   :  { %1814 = vmatprep.subr.msk.bf16.mxu1 %vm420_vm1, %v1811_v27  ;;  %1181 = vmatprep.subr.bf16.mxu0 %v2072_v10  ;;  %v2098_v27 = vld [vmem:[#allocation6 + $0xf0] ss:$8 sps:$4 sm:$0xff]  }
  0x8c   :  { %458 = vmatpush1.bf16.msra.mxu1 %v422_v31  ;;  %1182 = vmatpush1.bf16.msra.mxu0 %v2074_v11 }
  0x8d   :  { %474 = vmatprep.subr.bf16.mxu1 %v2015_v30 }
  0x8f   :  { %466 = vmatmul.mubr.bf16.vlgmr.msra.gmra.mrb[0].mxu1 %v114_v33 }
  0x90   :  { %475 = vmatpush1.bf16.msra.mxu1 %v2013_v32  ;;  %1817 = vmatprep.mubr.msk.bf16.mxu1 %vm416_vm0, %v115_v12  ;;  %v2075_v12 = vld [vmem:[#allocation6 + $0x84] ss:$8 sps:$4 sm:$0xff]  }
  0x91   :  { %476 = vmatprep.subr.bf16.mxu1 %v2018_v34  ;;  %1183 = vmatprep.subr.bf16.mxu0 %v2075_v12 }
  0x92   :  { %1184 = vmatpush1.bf16.msra.mxu0 %v2077_v13 }
  0x93   :  { %1185 = vmatprep.subr.bf16.mxu0 %v2078_v14 }
  0x94   :  { %477 = vmatpush1.bf16.msra.mxu1 %v2016_v35 }
  0x95   :  { %478 = vmatprep.subr.bf16.mxu1 %v2021_v36 }
  0x96   :  { %1186 = vmatpush1.bf16.msra.mxu0 %v2080_v15 }
  0x97   :  { %1187 = vmatprep.subr.bf16.mxu0 %v2081_v16 }
  0x98   :  { %479 = vmatpush1.bf16.msra.mxu1 %v2019_v37 }
  0x99   :  { %480 = vmatprep.subr.bf16.mxu1 %v2024_v38 }
  0x9a   :  { %1188 = vmatpush1.bf16.msra.mxu0 %v2083_v17 }
  0x9b   :  { %1189 = vmatprep.subr.bf16.mxu0 %v2084_v18 }
  0x9c   :  { %481 = vmatpush1.bf16.msra.mxu1 %v2022_v39 }
  0x9d   :  { %482 = vmatprep.subr.bf16.mxu1 %v2027_v40 }
  0x9e   :  { %1190 = vmatpush1.bf16.msra.mxu0 %v2086_v19 }
  0x9f   :  { %1191 = vmatprep.subr.bf16.mxu0 %v2087_v20 }
  0xa0   :  { %483 = vmatpush1.bf16.msra.mxu1 %v2025_v41 }
  0xa1   :  { %484 = vmatprep.subr.bf16.mxu1 %v2030_v42 }
  0xa2   :  { %1192 = vmatpush1.bf16.msra.mxu0 %v2089_v21 }
  0xa3   :  { %1193 = vmatprep.subr.bf16.mxu0 %v2090_v22 }
  0xa4   :  { %485 = vmatpush1.bf16.msra.mxu1 %v2028_v43 }
  0xa5   :  { %486 = vmatprep.subr.bf16.mxu1 %v2033_v44 }
  0xa6   :  { %1194 = vmatpush1.bf16.msra.mxu0 %v2092_v23 }
  0xa7   :  { %1195 = vmatprep.subr.bf16.mxu0 %v2093_v24 }
  0xa8   :  { %487 = vmatpush1.bf16.msra.mxu1 %v2031_v45 }
  0xa9   :  { %488 = vmatprep.subr.bf16.mxu1 %v2036_v46 }
  0xaa   :  { %1196 = vmatpush1.bf16.msra.mxu0 %v2095_v25 }
  0xab   :  { %1197 = vmatprep.subr.bf16.mxu0 %v2096_v26 }
  0xac   :  { %489 = vmatpush1.bf16.msra.mxu1 %v2034_v47 }
  0xad   :  { %490 = vmatprep.subr.bf16.mxu1 %v2039_v48 }
  0xae   :  { %1198 = vmatpush1.bf16.msra.mxu0 %v2098_v27 }
  0xaf   :  { %1208 = vmatprep.subr.bf16.mxu0 %v2101_v28 }
  0xb0   :  { %491 = vmatpush1.bf16.msra.mxu1 %v2037_v49 }
  0xb1   :  { %492 = vmatprep.subr.bf16.mxu1 %v2042_v50 }
  0xb4   :  { %493 = vmatpush1.bf16.msra.mxu1 %v2040_v51 }
  0xb5   :  { %494 = vmatprep.subr.bf16.mxu1 %v2045_v52 }
  0xb8   :  { %495 = vmatpush1.bf16.msra.mxu1 %v2043_v53 }
  0xb9   :  { %496 = vmatprep.subr.bf16.mxu1 %v2048_v54 }
  0xbc   :  { %497 = vmatpush1.bf16.msra.mxu1 %v2046_v56 }
  0xbd   :  { %1816 = vmatprep.subr.msk.bf16.mxu1 %vm420_vm1, %v1813_v57 }
  0xc0   :  { %499 = vmatpush1.bf16.msra.mxu1 %v428_v59 }
  0xc3   :  { %507 = vmatmul.mubr.bf16.vlgmr.msra.gmra.mrb[4].mxu1 %v114_v33 }
 0x162   :  { %v2470_v29 = vpop.f32.mrb[0].mxu1 }
 0x163   :  { %v517_v30 = vrot.slane %v2470_v29, 4  ;;  %v541_v31 = vmul.f32 %v2470_v29, %v2470_v29  ;;  %v2475_v32 = vpop.f32.mrb[1].mxu1 }
 0x164   :  { %v523_v33 = vrot.slane %v2475_v32, 4  ;;  %v542_v34 = vmul.f32 %v2475_v32, %v2475_v32  ;;  %v471_v35 = vpop.f32.mrb[2].mxu1 }
 0x165   :  { %v518_v36 = vadd.f32 %v517_v30, %v2470_v29  ;;  %v545_v37 = vrot.slane %v541_v31, 4  ;;  %v472_v38 = vpop.f32.mrb[3].mxu1 }
 0x166   :  { %v524_v39 = vadd.f32 %v523_v33, %v2475_v32  ;;  %v551_v40 = vrot.slane %v542_v34, 4 }
 0x167   :  { %v519_v41 = vrot.slane %v518_v36, 2  ;;  %v546_v42 = vadd.f32 %v545_v37, %v541_v31 }
 0x168   :  { %v525_v43 = vrot.slane %v524_v39, 2  ;;  %v552_v44 = vadd.f32 %v551_v40, %v542_v34 }
 0x169   :  { %v520_v45 = vadd.f32 %v519_v41, %v518_v36  ;;  %v547_v46 = vrot.slane %v546_v42, 2 }
 0x16a   :  { %v526_v47 = vadd.f32 %v525_v43, %v524_v39  ;;  %v553_v48 = vrot.slane %v552_v44, 2 }
 0x16b   :  { %v521_v49 = vrot.slane %v520_v45, 1  ;;  %v548_v50 = vadd.f32 %v547_v46, %v546_v42 }
 0x16c   :  { %v527_v51 = vrot.slane %v526_v47, 1  ;;  %v554_v52 = vadd.f32 %v553_v48, %v552_v44 }
 0x16d   :  { %v522_v53 = vadd.f32 %v521_v49, %v520_v45  ;;  %v549_v54 = vrot.slane %v548_v50, 1 }
 0x16e   :  { %v528_v55 = vadd.f32 %v527_v51, %v526_v47  ;;  %v555_v56 = vrot.slane %v554_v52, 1 }
 0x16f   :  { %v550_v57 = vadd.f32 %v549_v54, %v548_v50  ;;  %v2482_v58 = vmul.f32 0.125, %v522_v53  ;;  %v2318_v50 = vmov 1966171168  }
 0x170   :  { %v556_v59 = vadd.f32 %v555_v56, %v554_v52  ;;  %v2484_v60 = vmul.f32 0.125, %v528_v55  ;;  %v600_v51 = vunpack.c.l.s4 %v2318_v50  ;;  %v602_v52 = vlaneseq }
 0x171   :  { %v573_v61 = vmul.f32 0.125, %v550_v57  ;;  %v577_v62 = vmul.f32 %v2482_v58, %v2482_v58 }
 0x172   :  { %v574_v63 = vmul.f32 0.125, %v556_v59  ;;  %v578_v0 = vmul.f32 %v2484_v60, %v2484_v60  ;;  %v601_v53 = vunpack.c.0.s8 %v600_v51  ;;  %v603_v54 = vshrl.u32 %v602_v52, 7 }
 0x173   :  { %v581_v1 = vsub.f32 %v573_v61, %v577_v62 }
 0x174   :  { %v582_v2 = vsub.f32 %v574_v63, %v578_v0  ;;  %v2502_v56 = vsub.s32 %v601_v53, %v603_v54  ;;  %v515_v0 = vld [vmem:[%s2593_s2] sm:$0xf] }
 0x175   :  { %v585_v3 = vadd.f32 1e-05, %v581_v1  ;;  %v2509_v1 = vsub.s32 0, %v603_v54 }
 0x176   :  { %v586_v4 = vadd.f32 1e-05, %v582_v2 }
 0x177   :  { %2171 = vrsqrt.f32 %v585_v3  ;;  %v634_v3 = vsub.s32 2, %v603_v54 }
 0x178   :  { %2173 = vrsqrt.f32 %v586_v4  ;;  %v638_v4 = vsub.s32 3, %v603_v54 }
 0x181   :  { %v2172_v5 = vpop.eup %2171 }
 0x182   :  { %v2174_v6 = vpop.eup %2173 }
 0x183   :  { %v597_v7 = vcombine.low %v2172_v5, %v2174_v6  ;;  %v2512_v5 = vsub.s32 1, %v603_v54 }
 0x185   :  { %v605_v61 = vrot.slane %v597_v7, %v2502_v56 }
 0x196   :  { %v2490_v8 = vpop.f32.mrb[4].mxu1 }
 0x197   :  { %v529_v9 = vrot.slane %v2490_v8, 4  ;;  %v543_v10 = vmul.f32 %v2490_v8, %v2490_v8  ;;  %v2495_v11 = vpop.f32.mrb[5].mxu1 }
 0x198   :  { %v535_v12 = vrot.slane %v2495_v11, 4  ;;  %v544_v13 = vmul.f32 %v2495_v11, %v2495_v11  ;;  %v512_v14 = vpop.f32.mrb[6].mxu1 }
 0x199   :  { %v530_v15 = vadd.f32 %v529_v9, %v2490_v8  ;;  %v557_v16 = vrot.slane %v543_v10, 4  ;;  %v513_v17 = vpop.f32.mrb[7].mxu1 }
 0x19a   :  { %v536_v18 = vadd.f32 %v535_v12, %v2495_v11  ;;  %v563_v19 = vrot.slane %v544_v13, 4 }
 0x19b   :  { %v531_v20 = vrot.slane %v530_v15, 2  ;;  %v558_v21 = vadd.f32 %v557_v16, %v543_v10 }
 0x19c   :  { %v537_v22 = vrot.slane %v536_v18, 2  ;;  %v564_v23 = vadd.f32 %v563_v19, %v544_v13 }
 0x19d   :  { %v532_v24 = vadd.f32 %v531_v20, %v530_v15  ;;  %v559_v25 = vrot.slane %v558_v21, 2 }
 0x19e   :  { %v538_v26 = vadd.f32 %v537_v22, %v536_v18  ;;  %v565_v27 = vrot.slane %v564_v23, 2  ;;  %v679_v22 = vpack.c.bf16 %v2475_v32, %v2475_v32 }
 0x19f   :  { %v533_v28 = vrot.slane %v532_v24, 1  ;;  %v560_v30 = vadd.f32 %v559_v25, %v558_v21  ;;  %v678_v21 = vpack.c.bf16 %v2470_v29, %v2470_v29 }
 0x1a0   :  { %v539_v31 = vrot.slane %v538_v26, 1  ;;  %v566_v33 = vadd.f32 %v565_v27, %v564_v23 }
 0x1a1   :  { %v534_v34 = vadd.f32 %v533_v28, %v532_v24  ;;  %v561_v35 = vrot.slane %v560_v30, 1 }
 0x1a2   :  { %v540_v36 = vadd.f32 %v539_v31, %v538_v26  ;;  %v567_v37 = vrot.slane %v566_v33, 1 }
 0x1a3   :  { %v562_v38 = vadd.f32 %v561_v35, %v560_v30  ;;  %v571_v39 = vmul.f32 0.125, %v534_v34  ;;  %v681_v30 = vpack.c.bf16 %v2495_v11, %v2495_v11 }
 0x1a4   :  { %v568_v40 = vadd.f32 %v567_v37, %v566_v33  ;;  %v572_v41 = vmul.f32 0.125, %v540_v36 }
 0x1a5   :  { %v575_v42 = vmul.f32 0.125, %v562_v38  ;;  %v579_v43 = vmul.f32 %v571_v39, %v571_v39 }
 0x1a6   :  { %v576_v44 = vmul.f32 0.125, %v568_v40  ;;  %v580_v45 = vmul.f32 %v572_v41, %v572_v41 }
 0x1a7   :  { %v583_v46 = vsub.f32 %v575_v42, %v579_v43 }
 0x1a8   :  { %v584_v47 = vsub.f32 %v576_v44, %v580_v45 }
 0x1a9   :  { %v587_v48 = vadd.f32 1e-05, %v583_v46 }
 0x1aa   :  { %v588_v49 = vadd.f32 1e-05, %v584_v47 }
 0x1ab   :  { %2175 = vrsqrt.f32 %v587_v48 }
 0x1ac   :  { %2177 = vrsqrt.f32 %v588_v49 }
 0x1b5   :  { %v2176_v55 = vpop.eup %2175 }
 0x1b6   :  { %v2178_v57 = vpop.eup %2177 }
 0x1b7   :  { %v598_v59 = vcombine.low %v2176_v55, %v2178_v57 }
 0x1b9   :  { %v612_v62 = vrot.slane %v598_v59, %v2502_v56 }
 0x1bb   :  { %v613_v63 = vcombine.low %v605_v61, %v612_v62 }
 0x1bd   :  { %v620_v2 = vrot.slane %v613_v63, %v2502_v56 }
 0x1bf   :  { %v622_v6 = vmul.f32 %v620_v2, %v515_v0 }
 0x1c1   :  { %v635_v9 = vrot.slane %v622_v6, %v634_v3  ;;  %v639_v10 = vrot.slane %v622_v6, %v638_v4  ;;  %v627_v7 = vrot.slane %v622_v6, %v2509_v1  ;;  %v631_v12 = vrot.slane %v622_v6, %v2512_v5  ;;  %v2099_v6 = vld [vmem:[#allocation6 + $0x100] ss:$8 sps:$4 sm:$0xff]  }
 0x1c3   :  { %v646_v13 = vmul.f32 %v635_v9, %v571_v39  ;;  %v647_v14 = vmul.f32 %v639_v10, %v572_v41  ;;  %v685_v15 = vpack.c.bf16 %v639_v10, %v639_v10  ;;  %v644_v16 = vmul.f32 %v627_v7, %v2482_v58  ;;  %v516_v39 = vld [vmem:[%s2594_s3] sm:$0xf]  ;;  %v2104_v10 = vld [vmem:[#allocation6 + $0x114] ss:$8 sps:$4 sm:$0xff]  }
 0x1c4   :  { %v645_v17 = vmul.f32 %v631_v12, %v2484_v60  ;;  %v683_v18 = vpack.c.bf16 %v631_v12, %v631_v12  ;;  %v682_v19 = vpack.c.bf16 %v627_v7, %v627_v7  ;;  %v684_v20 = vpack.c.bf16 %v635_v9, %v635_v9  ;;  %v2102_v12 = vld [vmem:[#allocation6 + $0x110] ss:$8 sps:$4 sm:$0xff]  }
 0x1c5   :  { %v653_v23 = vcombine.low %v646_v13, %v647_v14  ;;  %v708_v24 = vpack.i.b16 %v685_v15, %v685_v15  ;;  %v680_v58 = vpack.c.bf16 %v2490_v8, %v2490_v8  ;;  %v2107_v13 = vld [vmem:[#allocation6 + $0x124] ss:$8 sps:$4 sm:$0xff]   ;;  %v2105_v14 = vld [vmem:[#allocation6 + $0x120] ss:$8 sps:$4 sm:$0xff]   ;;  %v2110_v15 = vld [vmem:[#allocation6 + $0x134] ss:$8 sps:$4 sm:$0xff]  }
 0x1c6   :  { %v652_v25 = vcombine.low %v644_v16, %v645_v17  ;;  %v694_v26 = vpack.i.b16 %v683_v18, %v683_v18  ;;  %v687_v27 = vpack.i.b16 %v682_v19, %v682_v19  ;;  %v701_v28 = vpack.i.b16 %v684_v20, %v684_v20  ;;  %v2108_v16 = vld [vmem:[#allocation6 + $0x130] ss:$8 sps:$4 sm:$0xff]   ;;  %v2113_v17 = vld [vmem:[#allocation6 + $0x144] ss:$8 sps:$4 sm:$0xff]   ;;  %v2111_v18 = vld [vmem:[#allocation6 + $0x140] ss:$8 sps:$4 sm:$0xff]  }
 0x1c7   :  { %v667_v60 = vrot.slane %v653_v23, %v2502_v56  ;;  %v713_v31 = vrot.slane %v708_v24, %v2509_v1  ;;  %v2116_v19 = vld [vmem:[#allocation6 + $0x154] ss:$8 sps:$4 sm:$0xff]   ;;  %v2114_v20 = vld [vmem:[#allocation6 + $0x150] ss:$8 sps:$4 sm:$0xff]  }
 0x1c8   :  { %v660_v29 = vrot.slane %v652_v25, %v2502_v56  ;;  %v699_v32 = vrot.slane %v694_v26, %v2509_v1  ;;  %v692_v33 = vrot.slane %v687_v27, %v2509_v1  ;;  %v706_v34 = vrot.slane %v701_v28, %v2509_v1  ;;  %v2122_v23 = vld [vmem:[#allocation6 + $0x174] ss:$8 sps:$4 sm:$0xff]   ;;  %v2120_v24 = vld [vmem:[#allocation6 + $0x170] ss:$8 sps:$4 sm:$0xff]   ;;  %v2125_v25 = vld [vmem:[#allocation6 + $0x184] ss:$8 sps:$4 sm:$0xff]  }
 0x1c9   :  { %v717_v35 = vmul.bf16 %v713_v31, %v681_v30  ;;  %v2123_v26 = vld [vmem:[#allocation6 + $0x180] ss:$8 sps:$4 sm:$0xff]   ;;  %v2128_v27 = vld [vmem:[#allocation6 + $0x194] ss:$8 sps:$4 sm:$0xff]   ;;  %v2126_v28 = vld [vmem:[#allocation6 + $0x190] ss:$8 sps:$4 sm:$0xff]  }
 0x1ca   :  { %v668_v36 = vcombine.low %v660_v29, %v667_v60  ;;  %v715_v37 = vmul.bf16 %v699_v32, %v679_v22  ;;  %v714_v38 = vmul.bf16 %v692_v33, %v678_v21  ;;  %v716_v8 = vmul.bf16 %v706_v34, %v680_v58  ;;  %v2119_v21 = vld [vmem:[#allocation6 + $0x164] ss:$8 sps:$4 sm:$0xff]   ;;  %v2117_v22 = vld [vmem:[#allocation6 + $0x160] ss:$8 sps:$4 sm:$0xff]   ;;  %v2134_v30 = vld [vmem:[#allocation6 + $0x1b4] ss:$8 sps:$4 sm:$0xff]  }
 0x1cb   :  { %v2131_v58 = vld [vmem:[#allocation6 + $0x1a4] ss:$8 sps:$4 sm:$0xff]   ;;  %v2129_v60 = vld [vmem:[#allocation6 + $0x1a0] ss:$8 sps:$4 sm:$0xff]   ;;  %v2132_v31 = vld [vmem:[#allocation6 + $0x1b0] ss:$8 sps:$4 sm:$0xff]  }
 0x1cc   :  { %v675_v11 = vrot.slane %v668_v36, %v2502_v56  ;;  %v2137_v29 = vld [vmem:[#allocation6 + $0x1c4] ss:$8 sps:$4 sm:$0xff]   ;;  %v2135_v32 = vld [vmem:[#allocation6 + $0x1c0] ss:$8 sps:$4 sm:$0xff]   ;;  %v2140_v33 = vld [vmem:[#allocation6 + $0x1d4] ss:$8 sps:$4 sm:$0xff]  }
 0x1cd   :  { %v2138_v34 = vld [vmem:[#allocation6 + $0x1d0] ss:$8 sps:$4 sm:$0xff]   ;;  %v2141_v36 = vld [vmem:[#allocation6 + $0x1e0] ss:$8 sps:$4 sm:$0xff]  }
 0x1ce   :  { %v677_v40 = vsub.f32 %v516_v39, %v675_v11  ;;  %v2147_v11 = vld [vmem:[#allocation7 + $0x40] sm:$0xff]  }
 0x1d0   :  { %v726_v41 = vrot.slane %v677_v40, %v2512_v5  ;;  %v722_v42 = vrot.slane %v677_v40, %v2509_v1  ;;  %v734_v43 = vrot.slane %v677_v40, %v638_v4  ;;  %v730_v44 = vrot.slane %v677_v40, %v634_v3  ;;  %v2148_v40 = vld [vmem:[#allocation7] sm:$0xff]  }
 0x1d2   :  { %v740_v45 = vpack.c.bf16 %v726_v41, %v726_v41  ;;  %v739_v46 = vpack.c.bf16 %v722_v42, %v722_v42  ;;  %v742_v47 = vpack.c.bf16 %v734_v43, %v734_v43  ;;  %v741_v48 = vpack.c.bf16 %v730_v44, %v730_v44  ;;  %v2149_v41 = vld [vmem:[#allocation7 + $0x48] sm:$0xff]   ;;  %v2151_v43 = vld [vmem:[#allocation7 + $0x50] sm:$0xff]  }
 0x1d3   :  { %v2150_v42 = vld [vmem:[#allocation7 + $0x8] sm:$0xff]   ;;  %v2152_v44 = vld [vmem:[#allocation7 + $0x10] sm:$0xff]  }
 0x1d4   :  { %v751_v49 = vpack.i.b16 %v740_v45, %v740_v45  ;;  %v744_v50 = vpack.i.b16 %v739_v46, %v739_v46  ;;  %v765_v51 = vpack.i.b16 %v742_v47, %v742_v47  ;;  %v758_v52 = vpack.i.b16 %v741_v48, %v741_v48  ;;  %v2153_v45 = vld [vmem:[#allocation7 + $0x58] sm:$0xff]   ;;  %v2155_v47 = vld [vmem:[#allocation7 + $0x60] sm:$0xff]  }
 0x1d5   :  { %v2154_v46 = vld [vmem:[#allocation7 + $0x18] sm:$0xff]   ;;  %v2156_v48 = vld [vmem:[#allocation7 + $0x20] sm:$0xff]  }
 0x1d6   :  { %v756_v53 = vrot.slane %v751_v49, %v2509_v1  ;;  %v749_v54 = vrot.slane %v744_v50, %v2509_v1  ;;  %v770_v55 = vrot.slane %v765_v51, %v2509_v1  ;;  %v763_v57 = vrot.slane %v758_v52, %v2509_v1  ;;  %v2157_v49 = vld [vmem:[#allocation7 + $0x68] sm:$0xff]   ;;  %v2159_v51 = vld [vmem:[#allocation7 + $0x70] sm:$0xff]  }
 0x1d7   :  { %v2158_v50 = vld [vmem:[#allocation7 + $0x28] sm:$0xff]   ;;  %v2160_v52 = vld [vmem:[#allocation7 + $0x30] sm:$0xff]  }
 0x1d8   :  { %v772_v59 = vadd.bf16 %v756_v53, %v715_v37  ;;  %v771_v61 = vadd.bf16 %v749_v54, %v714_v38  ;;  %v774_v62 = vadd.bf16 %v770_v55, %v717_v35  ;;  %v2542_v63 = vadd.bf16 %v763_v57, %v716_v8  ;;  %v2143_v35 = vld [vmem:[#allocation6 + $0x1e4] ss:$8 sps:$4 sm:$0xff]   ;;  %v2146_v37 = vld [vmem:[#allocation6 + $0x1f4] ss:$8 sps:$4 sm:$0xff]   ;;  %v2144_v38 = vld [vmem:[#allocation6 + $0x1f0] ss:$8 sps:$4 sm:$0xff]  }
 0x1d9   :  { %v2161_v53 = vld [vmem:[#allocation7 + $0x78] sm:$0xff]  }
 0x1da   :  { %v776_v0 = vmul.bf16 1009007652, %v772_v59  ;;  %v775_v2 = vmul.bf16 1009007652, %v771_v61  ;;  %v778_v3 = vmul.bf16 1009007652, %v774_v62 }
 0x1db   :  { %v777_v8 = vmul.bf16 1009007652, %v2542_v63  ;;  %v2162_v54 = vld [vmem:[#allocation7 + $0x38] sm:$0xff]  }
 0x1dc   :  { %v780_v4 = vmax.bf16 %v776_v0, %v772_v59  ;;  %v779_v9 = vmax.bf16 %v775_v2, %v771_v61  ;;  %v782_v7 = vmax.bf16 %v778_v3, %v774_v62 }
 0x1dd   :  { %v781_v39 = vmax.bf16 %v777_v8, %v2542_v63 }
 0x1de   :  { %1199 = vmatprep.mubr.bf16.mxu0 %v780_v4 }
 0x1df   :  { %1200 = vmatmul.mubr.bf16.vlgmr.msra.gmra.mrb[0].mxu0 %v779_v9 }
 0x1e0   :  { %1209 = vmatpush1.bf16.msra.mxu0 %v2099_v6  ;;  %1240 = vmatprep.mubr.bf16.mxu0 %v782_v7 }
 0x1e1   :  { %1210 = vmatprep.subr.bf16.mxu0 %v2104_v10 }
 0x1e4   :  { %1211 = vmatpush1.bf16.msra.mxu0 %v2102_v12 }
 0x1e5   :  { %1212 = vmatprep.subr.bf16.mxu0 %v2107_v13 }
 0x1e8   :  { %1213 = vmatpush1.bf16.msra.mxu0 %v2105_v14 }
 0x1e9   :  { %1214 = vmatprep.subr.bf16.mxu0 %v2110_v15 }
 0x1ec   :  { %1215 = vmatpush1.bf16.msra.mxu0 %v2108_v16 }
 0x1ed   :  { %1216 = vmatprep.subr.bf16.mxu0 %v2113_v17 }
 0x1f0   :  { %1217 = vmatpush1.bf16.msra.mxu0 %v2111_v18 }
 0x1f1   :  { %1218 = vmatprep.subr.bf16.mxu0 %v2116_v19 }
 0x1f4   :  { %1219 = vmatpush1.bf16.msra.mxu0 %v2114_v20 }
 0x1f5   :  { %1220 = vmatprep.subr.bf16.mxu0 %v2119_v21 }
 0x1f8   :  { %1221 = vmatpush1.bf16.msra.mxu0 %v2117_v22 }
 0x1f9   :  { %1222 = vmatprep.subr.bf16.mxu0 %v2122_v23 }
 0x1fc   :  { %1223 = vmatpush1.bf16.msra.mxu0 %v2120_v24 }
 0x1fd   :  { %1224 = vmatprep.subr.bf16.mxu0 %v2125_v25 }
 0x200   :  { %1225 = vmatpush1.bf16.msra.mxu0 %v2123_v26 }
 0x201   :  { %1226 = vmatprep.subr.bf16.mxu0 %v2128_v27 }
 0x204   :  { %1227 = vmatpush1.bf16.msra.mxu0 %v2126_v28 }
 0x205   :  { %1228 = vmatprep.subr.bf16.mxu0 %v2131_v58 }
 0x208   :  { %1229 = vmatpush1.bf16.msra.mxu0 %v2129_v60 }
 0x209   :  { %1230 = vmatprep.subr.bf16.mxu0 %v2134_v30 }
 0x20c   :  { %1231 = vmatpush1.bf16.msra.mxu0 %v2132_v31 }
 0x20d   :  { %1232 = vmatprep.subr.bf16.mxu0 %v2137_v29 }
 0x210   :  { %1233 = vmatpush1.bf16.msra.mxu0 %v2135_v32 }
 0x211   :  { %1234 = vmatprep.subr.bf16.mxu0 %v2140_v33 }
 0x214   :  { %1235 = vmatpush1.bf16.msra.mxu0 %v2138_v34 }
 0x215   :  { %1236 = vmatprep.subr.bf16.mxu0 %v2143_v35 }
 0x218   :  { %1237 = vmatpush1.bf16.msra.mxu0 %v2141_v36 }
 0x219   :  { %1238 = vmatprep.subr.bf16.mxu0 %v2146_v37 }
 0x21c   :  { %1239 = vmatpush1.bf16.msra.mxu0 %v2144_v38 }
 0x21d   :  { %1906 = vmatprep.subr.bf16.mxu0 %v2147_v11 }
 0x21f   :  { %1241 = vmatmul.mubr.bf16.vlgmr.msra.gmra.mrb[0].mxu0 %v781_v39  ;;  %v1249_v39 = vld [vmem:[%s2596_s5] sm:$0x3] }
 0x220   :  { %1907 = vmatpush3.bf16.msra.mxu0 %v2148_v40 }
 0x221   :  { %1908 = vmatprep.subr.bf16.mxu0 %v2149_v41 }
 0x224   :  { %1909 = vmatpush3.bf16.msra.mxu0 %v2150_v42 }
 0x225   :  { %1910 = vmatprep.subr.bf16.mxu0 %v2151_v43 }
 0x228   :  { %1911 = vmatpush3.bf16.msra.mxu0 %v2152_v44 }
 0x229   :  { %1912 = vmatprep.subr.bf16.mxu0 %v2153_v45 }
 0x22c   :  { %1913 = vmatpush3.bf16.msra.mxu0 %v2154_v46 }
 0x22d   :  { %1914 = vmatprep.subr.bf16.mxu0 %v2155_v47 }
 0x230   :  { %1915 = vmatpush3.bf16.msra.mxu0 %v2156_v48 }
 0x231   :  { %1916 = vmatprep.subr.bf16.mxu0 %v2157_v49 }
 0x234   :  { %1917 = vmatpush3.bf16.msra.mxu0 %v2158_v50 }
 0x235   :  { %1918 = vmatprep.subr.bf16.mxu0 %v2159_v51 }
 0x238   :  { %1919 = vmatpush3.bf16.msra.mxu0 %v2160_v52 }
 0x239   :  { %1920 = vmatprep.subr.bf16.mxu0 %v2161_v53 }
 0x23c   :  { %1921 = vmatpush3.bf16.msra.mxu0 %v2162_v54 }
 0x2f2   :  { %v2546_v55 = vpop.f32.mrb[0].mxu0 }
 0x2f3   :  { %v1251_v57 = vrot.slane %v2546_v55, 4  ;;  %v1263_v59 = vmul.f32 %v2546_v55, %v2546_v55  ;;  %v1244_v61 = vpop.f32.mrb[1].mxu0  ;;  %v1340_v50 = vpack.c.bf16 %v2546_v55, %v2546_v55 }
 0x2f4   :  { %v1257_v62 = vrot.slane %v1244_v61, 4  ;;  %v1264_v63 = vmul.f32 %v1244_v61, %v1244_v61  ;;  %v1246_v0 = vpop.f32.mrb[2].mxu0  ;;  %v1341_v52 = vpack.c.bf16 %v1244_v61, %v1244_v61 }
 0x2f5   :  { %v1252_v2 = vadd.f32 %v1251_v57, %v2546_v55  ;;  %v1265_v3 = vrot.slane %v1263_v59, 4  ;;  %v1247_v4 = vpop.f32.mrb[3].mxu0  ;;  %v1250_v57 = vld [vmem:[%s2597_s6] sm:$0x3] }
 0x2f6   :  { %v1258_v6 = vadd.f32 %v1257_v62, %v1244_v61  ;;  %v1271_v9 = vrot.slane %v1264_v63, 4 }
 0x2f7   :  { %v1253_v10 = vrot.slane %v1252_v2, 2  ;;  %v1266_v7 = vadd.f32 %v1265_v3, %v1263_v59 }
 0x2f8   :  { %v1259_v12 = vrot.slane %v1258_v6, 2  ;;  %v1272_v13 = vadd.f32 %v1271_v9, %v1264_v63 }
 0x2f9   :  { %v1254_v14 = vadd.f32 %v1253_v10, %v1252_v2  ;;  %v1267_v15 = vrot.slane %v1266_v7, 2 }
 0x2fa   :  { %v1260_v16 = vadd.f32 %v1259_v12, %v1258_v6  ;;  %v1273_v17 = vrot.slane %v1272_v13, 2 }
 0x2fb   :  { %v1255_v18 = vrot.slane %v1254_v14, 1  ;;  %v1268_v19 = vadd.f32 %v1267_v15, %v1266_v7 }
 0x2fc   :  { %v1261_v20 = vrot.slane %v1260_v16, 1  ;;  %v1274_v21 = vadd.f32 %v1273_v17, %v1272_v13  ;;  %v2164_v17 = vld [vmem:[#allocation9 + $0x8] sm:$0xff]  }
 0x2fd   :  { %v1256_v22 = vadd.f32 %v1255_v18, %v1254_v14  ;;  %v1269_v23 = vrot.slane %v1268_v19, 1  ;;  %v2165_v18 = vld [vmem:[#allocation9 + $0x10] sm:$0xff]  }
 0x2fe   :  { %v1262_v24 = vadd.f32 %v1261_v20, %v1260_v16  ;;  %v1275_v25 = vrot.slane %v1274_v21, 1  ;;  %v2163_v16 = vld [vmem:[#allocation9] sm:$0xff]  }
 0x2ff   :  { %v1270_v26 = vadd.f32 %v1269_v23, %v1268_v19  ;;  %v1277_v27 = vmul.f32 0.125, %v1256_v22  ;;  %v2166_v19 = vld [vmem:[#allocation9 + $0x18] sm:$0xff]   ;;  %v2167_v20 = vld [vmem:[#allocation9 + $0x20] sm:$0xff]   ;;  %v2169_v22 = vld [vmem:[#allocation9 + $0x30] sm:$0xff]  }
 0x300   :  { %v1276_v28 = vadd.f32 %v1275_v25, %v1274_v21  ;;  %v1278_v58 = vmul.f32 0.125, %v1262_v24  ;;  %v2168_v21 = vld [vmem:[#allocation9 + $0x28] sm:$0xff]   ;;  %v2170_v23 = vld [vmem:[#allocation9 + $0x38] sm:$0xff]  }
 0x301   :  { %v1279_v60 = vmul.f32 0.125, %v1270_v26  ;;  %v1281_v30 = vmul.f32 %v1277_v27, %v1277_v27 }
 0x302   :  { %v1280_v31 = vmul.f32 0.125, %v1276_v28  ;;  %v1282_v29 = vmul.f32 %v1278_v58, %v1278_v58 }
 0x303   :  { %v1283_v32 = vsub.f32 %v1279_v60, %v1281_v30 }
 0x304   :  { %v1284_v33 = vsub.f32 %v1280_v31, %v1282_v29 }
 0x305   :  { %v1285_v34 = vadd.f32 1e-05, %v1283_v32 }
 0x306   :  { %v1286_v35 = vadd.f32 1e-05, %v1284_v33 }
 0x307   :  { %2179 = vrsqrt.f32 %v1285_v34 }
 0x308   :  { %2181 = vrsqrt.f32 %v1286_v35 }
 0x311   :  { %v2180_v36 = vpop.eup %2179 }
 0x312   :  { %v2182_v37 = vpop.eup %2181 }
 0x313   :  { %v1291_v38 = vcombine.low %v2180_v36, %v2182_v37 }
 0x315   :  { %v1298_v8 = vrot.slane %v1291_v38, %v2502_v56 }
 0x317   :  { %v1305_v11 = vrot.slane %v1298_v8, %v2502_v56 }
 0x319   :  { %v1307_v40 = vmul.f32 %v1305_v11, %v1249_v39 }
 0x31b   :  { %v1312_v41 = vrot.slane %v1307_v40, %v2509_v1  ;;  %v1316_v42 = vrot.slane %v1307_v40, %v2512_v5 }
 0x31d   :  { %v1319_v43 = vmul.f32 %v1312_v41, %v1277_v27  ;;  %v1320_v44 = vmul.f32 %v1316_v42, %v1278_v58  ;;  %v1343_v45 = vpack.c.bf16 %v1316_v42, %v1316_v42  ;;  %v1342_v46 = vpack.c.bf16 %v1312_v41, %v1312_v41 }
 0x31f   :  { %v1323_v47 = vcombine.low %v1319_v43, %v1320_v44  ;;  %v1352_v48 = vpack.i.b16 %v1343_v45, %v1343_v45  ;;  %v1345_v49 = vpack.i.b16 %v1342_v46, %v1342_v46  ;;  %v1561_v43 = vld [vmem:[%s2599_s8] sm:$0x1] }
 0x320   :  { %v1562_v46 = vld [vmem:[%s2600_s9] sm:$0x1] }
 0x321   :  { %v1330_v51 = vrot.slane %v1323_v47, %v2502_v56  ;;  %v1357_v53 = vrot.slane %v1352_v48, %v2509_v1  ;;  %v1350_v54 = vrot.slane %v1345_v49, %v2509_v1 }
 0x323   :  { %v1359_v59 = vmul.bf16 %v1357_v53, %v1341_v52  ;;  %v1337_v62 = vrot.slane %v1330_v51, %v2502_v56  ;;  %v1358_v63 = vmul.bf16 %v1350_v54, %v1340_v50 }
 0x325   :  { %v1339_v0 = vsub.f32 %v1250_v57, %v1337_v62 }
 0x327   :  { %v1368_v2 = vrot.slane %v1339_v0, %v2512_v5  ;;  %v1364_v55 = vrot.slane %v1339_v0, %v2509_v1  ;;  %v2319_v5 = vmov 0.0  }
 0x328   :  { %1937 = vmatprep.subr.bf16.mxu1 %v2319_v5  ;;  %1953 = vmatprep.mubr.msk.bf16.mxu1 %vm2320_vm2, %v2319_v5 }
 0x329   :  { %v1372_v3 = vpack.c.bf16 %v1368_v2, %v1368_v2  ;;  %v1371_v4 = vpack.c.bf16 %v1364_v55, %v1364_v55  ;;  %1938 = vmatpush3.bf16.msra.mxu1 %v2163_v16 }
 0x32a   :  { %1939 = vmatprep.subr.bf16.mxu1 %v2319_v5 }
 0x32b   :  { %v1381_v61 = vpack.i.b16 %v1372_v3, %v1372_v3  ;;  %v1374_v6 = vpack.i.b16 %v1371_v4, %v1371_v4 }
 0x32d   :  { %v1386_v9 = vrot.slane %v1381_v61, %v2509_v1  ;;  %v1379_v10 = vrot.slane %v1374_v6, %v2509_v1  ;;  %1940 = vmatpush3.bf16.msra.mxu1 %v2164_v17 }
 0x32e   :  { %1941 = vmatprep.subr.bf16.mxu1 %v2319_v5 }
 0x32f   :  { %v1388_v7 = vadd.bf16 %v1386_v9, %v1359_v59  ;;  %v1387_v12 = vadd.bf16 %v1379_v10, %v1358_v63 }
 0x331   :  { %v1390_v13 = vmul.bf16 1009007652, %v1388_v7  ;;  %v1389_v14 = vmul.bf16 1009007652, %v1387_v12  ;;  %1942 = vmatpush3.bf16.msra.mxu1 %v2165_v18 }
 0x332   :  { %1943 = vmatprep.subr.bf16.mxu1 %v2319_v5 }
 0x333   :  { %v1392_v15 = vmax.bf16 %v1390_v13, %v1388_v7  ;;  %v1391_v56 = vmax.bf16 %v1389_v14, %v1387_v12 }
 0x335   :  { %1553 = vmatprep.mubr.bf16.mxu0 %v1392_v15  ;;  %1944 = vmatpush3.bf16.msra.mxu1 %v2166_v19 }
 0x336   :  { %1554 = vmatmul.mubr.bf16.vlgmr.msra.gmra.mrb[4].mxu0 %v1391_v56  ;;  %1945 = vmatprep.subr.bf16.mxu1 %v2319_v5 }
 0x339   :  { %1946 = vmatpush3.bf16.msra.mxu1 %v2167_v20 }
 0x33a   :  { %1947 = vmatprep.subr.bf16.mxu1 %v2319_v5 }
 0x33d   :  { %1948 = vmatpush3.bf16.msra.mxu1 %v2168_v21 }
 0x33e   :  { %1949 = vmatprep.subr.bf16.mxu1 %v2319_v5 }
 0x341   :  { %1950 = vmatpush3.bf16.msra.mxu1 %v2169_v22 }
 0x342   :  { %1951 = vmatprep.subr.bf16.mxu1 %v2319_v5 }
 0x345   :  { %1952 = vmatpush3.bf16.msra.mxu1 %v2170_v23  ;;  %v1710_v23 = vld [vmem:[%s2602_s11] sm:$0x1] }
 0x409   :  { %v1922_v24 = vpop.f32.mrb[4].mxu0 }
 0x40a   :  { %v1923_v25 = vpop.f32.mrb[5].mxu0 }
 0x40b   :  { %v1924_v26 = vadd.f32 %v1923_v25, %v1922_v24  ;;  %v1925_v27 = vpop.f32.mrb[6].mxu0 }
 0x40c   :  { %v1926_v28 = vpop.f32.mrb[7].mxu0 }
 0x40d   :  { %v1563_v58 = vrot.slane %v1924_v26, 4  ;;  %v1569_v60 = vmul.f32 %v1924_v26, %v1924_v26  ;;  %v1585_v53 = vpack.c.bf16 %v1924_v26, %v1924_v26 }
 0x40f   :  { %v1564_v30 = vadd.f32 %v1924_v26, %v1563_v58  ;;  %v1570_v31 = vrot.slane %v1569_v60, 4  ;;  %v1711_v26 = vld [vmem:[%s2603_s12] sm:$0x1] }
 0x411   :  { %v1565_v29 = vrot.slane %v1564_v30, 2  ;;  %v1571_v32 = vadd.f32 %v1570_v31, %v1569_v60 }
 0x413   :  { %v1566_v33 = vadd.f32 %v1565_v29, %v1564_v30  ;;  %v1572_v34 = vrot.slane %v1571_v32, 2 }
 0x415   :  { %v1567_v35 = vrot.slane %v1566_v33, 1  ;;  %v1573_v36 = vadd.f32 %v1572_v34, %v1571_v32 }
 0x417   :  { %v1568_v37 = vadd.f32 %v1567_v35, %v1566_v33  ;;  %v1574_v38 = vrot.slane %v1573_v36, 1 }
 0x419   :  { %v1575_v8 = vadd.f32 %v1574_v38, %v1573_v36  ;;  %v1576_v39 = vmul.f32 0.125, %v1568_v37 }
 0x41b   :  { %v1577_v11 = vmul.f32 0.125, %v1575_v8  ;;  %v1578_v40 = vmul.f32 %v1576_v39, %v1576_v39 }
 0x41d   :  { %v1579_v41 = vsub.f32 %v1577_v11, %v1578_v40 }
 0x41f   :  { %v1580_v42 = vadd.f32 1e-05, %v1579_v41 }
 0x421   :  { %2183 = vrsqrt.f32 %v1580_v42 }
 0x42b   :  { %v2184_v44 = vpop.eup %2183 }
 0x42c   :  { %v1582_v45 = vmul.f32 %v2184_v44, %v1561_v43 }
 0x42e   :  { %v1583_v47 = vmul.f32 %v1582_v45, %v1576_v39  ;;  %v1586_v48 = vpack.c.bf16 %v1582_v45, %v1582_v45 }
 0x430   :  { %v1588_v49 = vpack.i.b16 %v1586_v48, %v1586_v48  ;;  %v1584_v50 = vsub.f32 %v1562_v46, %v1583_v47 }
 0x432   :  { %v1593_v51 = vrot.slane %v1588_v49, %v2509_v1  ;;  %v1595_v52 = vpack.c.bf16 %v1584_v50, %v1584_v50 }
 0x434   :  { %v1597_v54 = vpack.i.b16 %v1595_v52, %v1595_v52  ;;  %v1594_v57 = vmul.bf16 %v1593_v51, %v1585_v53 }
 0x436   :  { %v1602_v59 = vrot.slane %v1597_v54, %v2509_v1 }
 0x438   :  { %v1603_v62 = vadd.bf16 %v1602_v59, %v1594_v57 }
 0x43a   :  { %v1604_v63 = vmul.bf16 1009007652, %v1603_v62 }
 0x43c   :  { %v1605_v0 = vmax.bf16 %v1604_v63, %v1603_v62 }
 0x43e   :  { %1954 = vmatmul.mubr.bf16.vlgmr.msra.gmra.mrb[8].mxu1 %v1605_v0 }
 0x511   :  { %v1704_v2 = vpop.f32.mrb[8].mxu1 }
 0x512   :  { %v1712_v55 = vrot.slane %v1704_v2, 4  ;;  %v1718_v3 = vmul.f32 %v1704_v2, %v1704_v2  ;;  %v1955_v4 = vpop.f32.mrb[9].mxu1 }
 0x513   :  { %v1707_v61 = vpop.f32.mrb[10].mxu1 }
 0x514   :  { %v1713_v6 = vadd.f32 %v1712_v55, %v1704_v2  ;;  %v1719_v9 = vrot.slane %v1718_v3, 4  ;;  %v1956_v10 = vpop.f32.mrb[11].mxu1 }
 0x516   :  { %v1714_v7 = vrot.slane %v1713_v6, 2  ;;  %v1720_v12 = vadd.f32 %v1719_v9, %v1718_v3 }
 0x518   :  { %v1715_v13 = vadd.f32 %v1714_v7, %v1713_v6  ;;  %v1721_v14 = vrot.slane %v1720_v12, 2 }
 0x51a   :  { %v1716_v15 = vrot.slane %v1715_v13, 1  ;;  %v1722_v56 = vadd.f32 %v1721_v14, %v1720_v12 }
 0x51c   :  { %v1717_v16 = vadd.f32 %v1716_v15, %v1715_v13  ;;  %v1723_v5 = vrot.slane %v1722_v56, 1 }
 0x51e   :  { %v1724_v17 = vadd.f32 %v1723_v5, %v1722_v56  ;;  %v1725_v18 = vmul.f32 0.125, %v1717_v16 }
 0x520   :  { %v1726_v19 = vmul.f32 0.125, %v1724_v17  ;;  %v1727_v20 = vmul.f32 %v1725_v18, %v1725_v18 }
 0x522   :  { %v1728_v21 = vsub.f32 %v1726_v19, %v1727_v20 }
 0x524   :  { %v1729_v22 = vadd.f32 1e-05, %v1728_v21 }
 0x526   :  { %2185 = vrsqrt.f32 %v1729_v22 }
 0x530   :  { %v2186_v24 = vpop.eup %2185 }
 0x531   :  { %v1731_v25 = vmul.f32 %v2186_v24, %v1710_v23 }
 0x533   :  { %v1732_v27 = vmul.f32 %v1731_v25, %v1725_v18  ;;  %v1738_v28 = vrot.slane %v1731_v25, %v2509_v1 }
 0x535   :  { %v1733_v58 = vsub.f32 %v1711_v26, %v1732_v27  ;;  %v1740_v60 = vmul.f32 %v1738_v28, %v1704_v2 }
 0x537   :  { %v1745_v30 = vrot.slane %v1733_v58, %v2509_v1 }
 0x539   :  { %v1747_v31 = vadd.f32 %v1745_v30, %v1740_v60 }
 0x53b   :  { %v1748_v29 = vsub.f32 0.0, %v1747_v31 }
 0x53d   :  { %v1749_v32 = vmul.f32 1.442695, %v1748_v29 }
 0x53f   :  { %2187 = vpow2.f32 %v1749_v32 }
 0x549   :  { %v2188_v33 = vpop.eup %2187 }
 0x54a   :  { %v1751_v34 = vadd.f32 1.0, %v2188_v33 }
 0x54c   :  { %2189 = vrcp.f32 %v1751_v34 }
 0x556   :  { %v2190_v35 = vpop.eup %2189 }
 0x557   :  { %1754 = vst.msk [vmem:[%s2604_s13] sm:$0xff] %vm1753_vm3, %v2190_v35 }
 0x558   :  { %1759 = vsyncpa [#allocation3], 1 }
 0x559   :  { %1760 = vsyncpa [#allocation5], 1 }
 0x55a   :  { %1761 = vsyncpa [#allocation8], 1 }

</bundles_post_ra>
